<compile_context>
chip_gen: v7x
topology: tpu7x:2x2x1
jax: 0.10.0
libtpu: 0.0.40
codegen_flags: <defaults>
</compile_context>

<pallas_src>
import jax
import jax.numpy as jnp
from jax import lax
from jax.experimental import pallas as pl
from jax.experimental.pallas import tpu as pltpu

# ---------------- config (cfg.* from the original script, small synthetic values) ----
VOCAB_SIZE = 65                 # len(sorted(set(text))) — synthetic
VOCAB_PAD  = 128                # lane-dense padded vocab for MXU / stores
N_EMBD     = 32                 # cfg.n_embd
N_HEAD     = 4                  # cfg.n_head
N_LAYER    = 2                  # cfg.n_layer
BLOCK_SIZE = 8                  # cfg.block_size
HEAD_SIZE  = N_EMBD // N_HEAD
LN_EPS     = 1e-5


# ---------------- in-kernel helpers -------------------------------------------------
def _layernorm(x, gamma, beta):
    # x: (T, C) f32 ; gamma/beta: (1, C) f32
    mu = jnp.mean(x, axis=-1, keepdims=True)
    var = jnp.mean(jnp.square(x - mu), axis=-1, keepdims=True)
    return (x - mu) * lax.rsqrt(var + LN_EPS) * gamma + beta


def _heads(z):
    # (T, C) f32 -> (H, hs, T) f32 using layout-safe ops only:
    #   2-D transpose, then split the *leading* (sublane) dim — last dim unchanged.
    T = z.shape[0]
    return z.T.reshape(N_HEAD, HEAD_SIZE, T)


# ---------------- fused GPT forward kernel ------------------------------------------
def gpt_kernel(idx_ref,                               # SMEM (B, T) int32  (scalar prefetch)
               tok_emb_ref, pos_ref,                  # (VOCAB_PAD, C) f32, (T, C) f32
               wq_ref, wk_ref, wv_ref, wproj_ref, bproj_ref,
               ln1g_ref, ln1b_ref, ln2g_ref, ln2b_ref,
               w1_ref, b1_ref, w2_ref, b2_ref,
               lnfg_ref, lnfb_ref, wlm_ref, blm_ref,
               out_ref):                              # (1, T, VOCAB_PAD) f32
    b = pl.program_id(0)
    T = pos_ref.shape[0]
    C = N_EMBD
    hs = HEAD_SIZE
    f32 = jnp.float32

    # ---- token embedding gather as a one-hot MXU matmul (fused, no XLA gather) ----
    sub = lax.broadcasted_iota(jnp.int32, (T, VOCAB_PAD), 0)
    voc = lax.broadcasted_iota(jnp.int32, (T, VOCAB_PAD), 1)
    one_hot = jnp.zeros((T, VOCAB_PAD), f32)
    for t in range(T):                                # T is small & static
        tok_id = idx_ref[b, t]                        # scalar read from SMEM
        one_hot = jnp.where((sub == t) & (voc == tok_id), 1.0, one_hot)
    tok = jnp.dot(one_hot, tok_emb_ref[...],
                  preferred_element_type=f32)         # (T, C)
    x = tok + pos_ref[...]                            # (T, C) f32

    # ---- causal mask, built once and reused by every layer ----
    row = lax.broadcasted_iota(jnp.int32, (T, T), 0)
    col = lax.broadcasted_iota(jnp.int32, (T, T), 1)
    causal = row >= col                               # (T, T) bool
    scale = float(hs) ** -0.5

    for l in range(N_LAYER):                          # static unroll over layers
        # ---- multi-head causal self-attention on ln1(x), packed heads ----
        h = _layernorm(x, ln1g_ref[l], ln1b_ref[l])                      # (T, C)
        q = jnp.dot(h, wq_ref[l], preferred_element_type=f32)            # (T, C)
        k = jnp.dot(h, wk_ref[l], preferred_element_type=f32)
        v = jnp.dot(h, wv_ref[l], preferred_element_type=f32)

        qt, kt, vt = _heads(q), _heads(k), _heads(v)                     # (H, hs, T)
        wei = jnp.einsum('hdq,hdk->hqk', qt, kt,
                         preferred_element_type=f32) * scale             # (H, T, T)
        wei = jnp.where(causal[None], wei, -1e30)
        wei = wei - jnp.max(wei, axis=-1, keepdims=True)
        p = jnp.exp(wei)
        p = p / jnp.sum(p, axis=-1, keepdims=True)                       # softmax

        att = jnp.einsum('hdk,hqk->hdq', vt, p,
                         preferred_element_type=f32)                     # (H, hs, T)
        att = att.reshape(C, T).T                                        # (T, C)
        att = jnp.dot(att, wproj_ref[l],
                      preferred_element_type=f32) + bproj_ref[l]
        x = x + att                                                      # residual 1

        # ---- feed-forward on ln2(x) ----
        h2 = _layernorm(x, ln2g_ref[l], ln2b_ref[l])
        ff = jnp.dot(h2, w1_ref[l], preferred_element_type=f32) + b1_ref[l]
        ff = jnp.maximum(ff, 0.0)                                        # ReLU
        ff = jnp.dot(ff, w2_ref[l],
                     preferred_element_type=f32) + b2_ref[l]
        x = x + ff                                                       # residual 2

    # ---- final LayerNorm + lm_head (lane-dense, padded vocab) ----
    hf = _layernorm(x, lnfg_ref[...], lnfb_ref[...])
    logits = jnp.dot(hf, wlm_ref[...], preferred_element_type=f32) + blm_ref[...]
    out_ref[...] = logits[None].astype(out_ref.dtype)                    # (1, T, 128)


# ---------------- pallas_call wrapper -------------------------------------------------
def _const_spec(a):
    n = a.ndim
    return pl.BlockSpec(a.shape, lambda b, idx, n=n: (0,) * n)


@jax.jit
def gpt_forward(packed, idx):
    """idx: (B, T) int32 token ids -> logits (B, T, VOCAB_SIZE). targets=None path."""
    B, T = idx.shape
    pos = packed['pos_emb'][:T]                        # (T, C) f32

    args = (packed['tok_emb'], pos,
            packed['wq'], packed['wk'], packed['wv'], packed['wproj'], packed['bproj'],
            packed['ln1g'], packed['ln1b'], packed['ln2g'], packed['ln2b'],
            packed['w1'], packed['b1'], packed['w2'], packed['b2'],
            packed['lnfg'], packed['lnfb'], packed['wlm'], packed['blm'])

    grid_spec = pltpu.PrefetchScalarGridSpec(
        num_scalar_prefetch=1,
        grid=(B,),
        in_specs=[_const_spec(a) for a in args],
        out_specs=pl.BlockSpec((1, T, VOCAB_PAD), lambda b, idx_ref: (b, 0, 0)),
    )
    logits_p = pl.pallas_call(
        gpt_kernel,
        out_shape=jax.ShapeDtypeStruct((B, T, VOCAB_PAD), jnp.float32),
        grid_spec=grid_spec,
        compiler_params=pltpu.CompilerParams(dimension_semantics=("parallel",)),
    )(idx.astype(jnp.int32), *args)

    return logits_p[:, :, :VOCAB_SIZE]


# ---------------- parameter init (deterministic, matches _init_weights) --------------
def init_params(key):
    def normal(k, shape):
        return 0.02 * jax.random.normal(k, shape, dtype=jnp.float32)

    keys = iter(jax.random.split(key, 3 + N_LAYER * 6))
    params = {
        'tok_emb': normal(next(keys), (VOCAB_SIZE, N_EMBD)),
        'pos_emb': normal(next(keys), (BLOCK_SIZE, N_EMBD)),
        'lnfg': jnp.ones((1, N_EMBD), jnp.float32),
        'lnfb': jnp.zeros((1, N_EMBD), jnp.float32),
        'wlm': normal(next(keys), (N_EMBD, VOCAB_SIZE)),    # (in, out) = W.T
        'blm': jnp.zeros((1, VOCAB_SIZE), jnp.float32),
        'blocks': [],
    }
    for _ in range(N_LAYER):
        blk = {
            # per-head key/query/value Linears concatenated along the output axis
            'wq': normal(next(keys), (N_EMBD, N_HEAD * HEAD_SIZE)),
            'wk': normal(next(keys), (N_EMBD, N_HEAD * HEAD_SIZE)),
            'wv': normal(next(keys), (N_EMBD, N_HEAD * HEAD_SIZE)),
            'wproj': normal(next(keys), (N_HEAD * HEAD_SIZE, N_EMBD)),
            'bproj': jnp.zeros((1, N_EMBD), jnp.float32),
            'ln1g': jnp.ones((1, N_EMBD), jnp.float32),
            'ln1b': jnp.zeros((1, N_EMBD), jnp.float32),
            'ln2g': jnp.ones((1, N_EMBD), jnp.float32),
            'ln2b': jnp.zeros((1, N_EMBD), jnp.float32),
            'w1': normal(next(keys), (N_EMBD, 4 * N_EMBD)),
            'b1': jnp.zeros((1, 4 * N_EMBD), jnp.float32),
            'w2': normal(next(keys), (4 * N_EMBD, N_EMBD)),
            'b2': jnp.zeros((1, N_EMBD), jnp.float32),
        }
        params['blocks'].append(blk)
    return params


def pack_params(p):
    """Stack per-layer weights on a leading layer axis and pad vocab to 128 lanes.
    All weights stay f32 (tiny shapes; portable across Mosaic and interpret paths)."""
    bl = p['blocks']
    stack = lambda name: jnp.stack([blk[name] for blk in bl], axis=0)
    vpad = VOCAB_PAD - VOCAB_SIZE
    return {
        'tok_emb': jnp.pad(p['tok_emb'], ((0, vpad), (0, 0))),            # (128, C)
        'pos_emb': p['pos_emb'],                                          # (blk, C) f32
        'wq': stack('wq'), 'wk': stack('wk'),
        'wv': stack('wv'), 'wproj': stack('wproj'),
        'bproj': stack('bproj'),
        'ln1g': stack('ln1g'), 'ln1b': stack('ln1b'),
        'ln2g': stack('ln2g'), 'ln2b': stack('ln2b'),
        'w1': stack('w1'), 'b1': stack('b1'),
        'w2': stack('w2'), 'b2': stack('b2'),
        'lnfg': p['lnfg'], 'lnfb': p['lnfb'],
        'wlm': jnp.pad(p['wlm'], ((0, 0), (0, vpad))),                    # (C, 128)
        'blm': jnp.pad(p['blm'], ((0, 0), (0, vpad))),                    # (1, 128)
    }


if __name__ == "__main__":
    key = jax.random.PRNGKey(0)
    pkey, dkey = jax.random.split(key)
    params = init_params(pkey)
    packed = pack_params(params)

    B, T = 2, BLOCK_SIZE
    idx = jax.random.randint(dkey, (B, T), 0, VOCAB_SIZE, dtype=jnp.int32)

    logits = gpt_forward(packed, idx)
    jax.block_until_ready(logits)

    assert logits.shape == (B, T, VOCAB_SIZE)
    assert logits.dtype == jnp.float32
    assert bool(jnp.all(jnp.isfinite(logits)))
    print("KERNEL_OK")
</pallas_src>

<mosaic_0001>
module attributes {stable_mosaic.version = 11 : i64} {
  func.func @gpt_kernel(%arg0: i32, %arg1: memref<2x8xi32, #tpu.memory_space<smem>>, %arg2: memref<128x32xf32, #tpu.memory_space<vmem>>, %arg3: memref<8x32xf32, #tpu.memory_space<vmem>>, %arg4: memref<2x32x32xf32, #tpu.memory_space<vmem>>, %arg5: memref<2x32x32xf32, #tpu.memory_space<vmem>>, %arg6: memref<2x32x32xf32, #tpu.memory_space<vmem>>, %arg7: memref<2x32x32xf32, #tpu.memory_space<vmem>>, %arg8: memref<2x1x32xf32, #tpu.memory_space<vmem>>, %arg9: memref<2x1x32xf32, #tpu.memory_space<vmem>>, %arg10: memref<2x1x32xf32, #tpu.memory_space<vmem>>, %arg11: memref<2x1x32xf32, #tpu.memory_space<vmem>>, %arg12: memref<2x1x32xf32, #tpu.memory_space<vmem>>, %arg13: memref<2x32x128xf32, #tpu.memory_space<vmem>>, %arg14: memref<2x1x128xf32, #tpu.memory_space<vmem>>, %arg15: memref<2x128x32xf32, #tpu.memory_space<vmem>>, %arg16: memref<2x1x32xf32, #tpu.memory_space<vmem>>, %arg17: memref<1x32xf32, #tpu.memory_space<vmem>>, %arg18: memref<1x32xf32, #tpu.memory_space<vmem>>, %arg19: memref<32x128xf32, #tpu.memory_space<vmem>>, %arg20: memref<1x128xf32, #tpu.memory_space<vmem>>, %arg21: memref<1x8x128xf32, #tpu.memory_space<vmem>>) attributes {dimension_semantics = [#tpu.dimension_semantics<parallel>], iteration_bounds = array<i64: 2>, scalar_prefetch = 1 : i64, scratch_operands = 0 : i64, tpu.core_type = #tpu.core_type<tc>, window_params = [{pipeline_mode = #tpu.pipeline_mode<synchronous>, transform_indices = @transform_0, window_bounds = array<i64: 128, 32>}, {pipeline_mode = #tpu.pipeline_mode<synchronous>, transform_indices = @transform_1, window_bounds = array<i64: 8, 32>}, {pipeline_mode = #tpu.pipeline_mode<synchronous>, transform_indices = @transform_2, window_bounds = array<i64: 2, 32, 32>}, {pipeline_mode = #tpu.pipeline_mode<synchronous>, transform_indices = @transform_3, window_bounds = array<i64: 2, 32, 32>}, {pipeline_mode = #tpu.pipeline_mode<synchronous>, transform_indices = @transform_4, window_bounds = array<i64: 2, 32, 32>}, {pipeline_mode = #tpu.pipeline_mode<synchronous>, transform_indices = @transform_5, window_bounds = array<i64: 2, 32, 32>}, {pipeline_mode = #tpu.pipeline_mode<synchronous>, transform_indices = @transform_6, window_bounds = array<i64: 2, 1, 32>}, {pipeline_mode = #tpu.pipeline_mode<synchronous>, transform_indices = @transform_7, window_bounds = array<i64: 2, 1, 32>}, {pipeline_mode = #tpu.pipeline_mode<synchronous>, transform_indices = @transform_8, window_bounds = array<i64: 2, 1, 32>}, {pipeline_mode = #tpu.pipeline_mode<synchronous>, transform_indices = @transform_9, window_bounds = array<i64: 2, 1, 32>}, {pipeline_mode = #tpu.pipeline_mode<synchronous>, transform_indices = @transform_10, window_bounds = array<i64: 2, 1, 32>}, {pipeline_mode = #tpu.pipeline_mode<synchronous>, transform_indices = @transform_11, window_bounds = array<i64: 2, 32, 128>}, {pipeline_mode = #tpu.pipeline_mode<synchronous>, transform_indices = @transform_12, window_bounds = array<i64: 2, 1, 128>}, {pipeline_mode = #tpu.pipeline_mode<synchronous>, transform_indices = @transform_13, window_bounds = array<i64: 2, 128, 32>}, {pipeline_mode = #tpu.pipeline_mode<synchronous>, transform_indices = @transform_14, window_bounds = array<i64: 2, 1, 32>}, {pipeline_mode = #tpu.pipeline_mode<synchronous>, transform_indices = @transform_15, window_bounds = array<i64: 1, 32>}, {pipeline_mode = #tpu.pipeline_mode<synchronous>, transform_indices = @transform_16, window_bounds = array<i64: 1, 32>}, {pipeline_mode = #tpu.pipeline_mode<synchronous>, transform_indices = @transform_17, window_bounds = array<i64: 32, 128>}, {pipeline_mode = #tpu.pipeline_mode<synchronous>, transform_indices = @transform_18, window_bounds = array<i64: 1, 128>}, {transform_indices = @transform_19, window_bounds = array<i64: 1, 8, 128>}]} {
    %0 = tpu.iota {dimensions = array<i32: 0>} : vector<8x128xi32>
    %1 = tpu.iota {dimensions = array<i32: 1>} : vector<8x128xi32>
    %cst = arith.constant 0.000000e+00 : f32
    %2 = vector.broadcast %cst : f32 to vector<8x128xf32>
    %3 = arith.index_cast %arg0 : i32 to index
    %c0 = arith.constant 0 : index
    %4 = memref.load %arg1[%3, %c0] : memref<2x8xi32, #tpu.memory_space<smem>>
    %c0_i32 = arith.constant 0 : i32
    %5 = vector.broadcast %c0_i32 : i32 to vector<8x128xi32>
    %6 = arith.cmpi eq, %0, %5 : vector<8x128xi32>
    %7 = vector.broadcast %4 : i32 to vector<8x128xi32>
    %8 = arith.cmpi eq, %1, %7 : vector<8x128xi32>
    %9 = arith.andi %6, %8 : vector<8x128xi1>
    %cst_0 = arith.constant 1.000000e+00 : f32
    %10 = vector.broadcast %cst_0 : f32 to vector<8x128xf32>
    %11 = arith.select %9, %10, %2 : vector<8x128xi1>, vector<8x128xf32>
    %12 = arith.index_cast %arg0 : i32 to index
    %c1 = arith.constant 1 : index
    %13 = memref.load %arg1[%12, %c1] : memref<2x8xi32, #tpu.memory_space<smem>>
    %c1_i32 = arith.constant 1 : i32
    %14 = vector.broadcast %c1_i32 : i32 to vector<8x128xi32>
    %15 = arith.cmpi eq, %0, %14 : vector<8x128xi32>
    %16 = vector.broadcast %13 : i32 to vector<8x128xi32>
    %17 = arith.cmpi eq, %1, %16 : vector<8x128xi32>
    %18 = arith.andi %15, %17 : vector<8x128xi1>
    %cst_1 = arith.constant 1.000000e+00 : f32
    %19 = vector.broadcast %cst_1 : f32 to vector<8x128xf32>
    %20 = arith.select %18, %19, %11 : vector<8x128xi1>, vector<8x128xf32>
    %21 = arith.index_cast %arg0 : i32 to index
    %c2 = arith.constant 2 : index
    %22 = memref.load %arg1[%21, %c2] : memref<2x8xi32, #tpu.memory_space<smem>>
    %c2_i32 = arith.constant 2 : i32
    %23 = vector.broadcast %c2_i32 : i32 to vector<8x128xi32>
    %24 = arith.cmpi eq, %0, %23 : vector<8x128xi32>
    %25 = vector.broadcast %22 : i32 to vector<8x128xi32>
    %26 = arith.cmpi eq, %1, %25 : vector<8x128xi32>
    %27 = arith.andi %24, %26 : vector<8x128xi1>
    %cst_2 = arith.constant 1.000000e+00 : f32
    %28 = vector.broadcast %cst_2 : f32 to vector<8x128xf32>
    %29 = arith.select %27, %28, %20 : vector<8x128xi1>, vector<8x128xf32>
    %30 = arith.index_cast %arg0 : i32 to index
    %c3 = arith.constant 3 : index
    %31 = memref.load %arg1[%30, %c3] : memref<2x8xi32, #tpu.memory_space<smem>>
    %c3_i32 = arith.constant 3 : i32
    %32 = vector.broadcast %c3_i32 : i32 to vector<8x128xi32>
    %33 = arith.cmpi eq, %0, %32 : vector<8x128xi32>
    %34 = vector.broadcast %31 : i32 to vector<8x128xi32>
    %35 = arith.cmpi eq, %1, %34 : vector<8x128xi32>
    %36 = arith.andi %33, %35 : vector<8x128xi1>
    %cst_3 = arith.constant 1.000000e+00 : f32
    %37 = vector.broadcast %cst_3 : f32 to vector<8x128xf32>
    %38 = arith.select %36, %37, %29 : vector<8x128xi1>, vector<8x128xf32>
    %39 = arith.index_cast %arg0 : i32 to index
    %c4 = arith.constant 4 : index
    %40 = memref.load %arg1[%39, %c4] : memref<2x8xi32, #tpu.memory_space<smem>>
    %c4_i32 = arith.constant 4 : i32
    %41 = vector.broadcast %c4_i32 : i32 to vector<8x128xi32>
    %42 = arith.cmpi eq, %0, %41 : vector<8x128xi32>
    %43 = vector.broadcast %40 : i32 to vector<8x128xi32>
    %44 = arith.cmpi eq, %1, %43 : vector<8x128xi32>
    %45 = arith.andi %42, %44 : vector<8x128xi1>
    %cst_4 = arith.constant 1.000000e+00 : f32
    %46 = vector.broadcast %cst_4 : f32 to vector<8x128xf32>
    %47 = arith.select %45, %46, %38 : vector<8x128xi1>, vector<8x128xf32>
    %48 = arith.index_cast %arg0 : i32 to index
    %c5 = arith.constant 5 : index
    %49 = memref.load %arg1[%48, %c5] : memref<2x8xi32, #tpu.memory_space<smem>>
    %c5_i32 = arith.constant 5 : i32
    %50 = vector.broadcast %c5_i32 : i32 to vector<8x128xi32>
    %51 = arith.cmpi eq, %0, %50 : vector<8x128xi32>
    %52 = vector.broadcast %49 : i32 to vector<8x128xi32>
    %53 = arith.cmpi eq, %1, %52 : vector<8x128xi32>
    %54 = arith.andi %51, %53 : vector<8x128xi1>
    %cst_5 = arith.constant 1.000000e+00 : f32
    %55 = vector.broadcast %cst_5 : f32 to vector<8x128xf32>
    %56 = arith.select %54, %55, %47 : vector<8x128xi1>, vector<8x128xf32>
    %57 = arith.index_cast %arg0 : i32 to index
    %c6 = arith.constant 6 : index
    %58 = memref.load %arg1[%57, %c6] : memref<2x8xi32, #tpu.memory_space<smem>>
    %c6_i32 = arith.constant 6 : i32
    %59 = vector.broadcast %c6_i32 : i32 to vector<8x128xi32>
    %60 = arith.cmpi eq, %0, %59 : vector<8x128xi32>
    %61 = vector.broadcast %58 : i32 to vector<8x128xi32>
    %62 = arith.cmpi eq, %1, %61 : vector<8x128xi32>
    %63 = arith.andi %60, %62 : vector<8x128xi1>
    %cst_6 = arith.constant 1.000000e+00 : f32
    %64 = vector.broadcast %cst_6 : f32 to vector<8x128xf32>
    %65 = arith.select %63, %64, %56 : vector<8x128xi1>, vector<8x128xf32>
    %66 = arith.index_cast %arg0 : i32 to index
    %c7 = arith.constant 7 : index
    %67 = memref.load %arg1[%66, %c7] : memref<2x8xi32, #tpu.memory_space<smem>>
    %c7_i32 = arith.constant 7 : i32
    %68 = vector.broadcast %c7_i32 : i32 to vector<8x128xi32>
    %69 = arith.cmpi eq, %0, %68 : vector<8x128xi32>
    %70 = vector.broadcast %67 : i32 to vector<8x128xi32>
    %71 = arith.cmpi eq, %1, %70 : vector<8x128xi32>
    %72 = arith.andi %69, %71 : vector<8x128xi1>
    %cst_7 = arith.constant 1.000000e+00 : f32
    %73 = vector.broadcast %cst_7 : f32 to vector<8x128xf32>
    %74 = arith.select %72, %73, %65 : vector<8x128xi1>, vector<8x128xf32>
    %c0_8 = arith.constant 0 : index
    %c0_9 = arith.constant 0 : index
    %75 = vector.load %arg2[%c0_8, %c0_9] : memref<128x32xf32, #tpu.memory_space<vmem>>, vector<128x32xf32>
    %cst_10 = arith.constant dense<0.000000e+00> : vector<8x32xf32>
    %76 = tpu.matmul %74, %75, %cst_10 {dimension_numbers = #tpu.dot_dimension_numbers<[1], [0], [0], [1], [0, 0, 1, 1], [], []>} : vector<8x128xf32>, vector<128x32xf32>, vector<8x32xf32> -> vector<8x32xf32>
    %c0_11 = arith.constant 0 : index
    %c0_12 = arith.constant 0 : index
    %77 = vector.load %arg3[%c0_11, %c0_12] : memref<8x32xf32, #tpu.memory_space<vmem>>, vector<8x32xf32>
    %78 = arith.addf %76, %77 : vector<8x32xf32>
    %79 = tpu.iota {dimensions = array<i32: 0>} : vector<8x8xi32>
    %80 = tpu.iota {dimensions = array<i32: 1>} : vector<8x8xi32>
    %81 = arith.cmpi sge, %79, %80 : vector<8x8xi32>
    %c0_13 = arith.constant 0 : index
    %c0_14 = arith.constant 0 : index
    %c0_15 = arith.constant 0 : index
    %82 = vector.load %arg9[%c0_13, %c0_14, %c0_15] : memref<2x1x32xf32, #tpu.memory_space<vmem>>, vector<1x1x32xf32>
    %83 = vector.shape_cast %82 : vector<1x1x32xf32> to vector<1x32xf32>
    %c0_16 = arith.constant 0 : index
    %c0_17 = arith.constant 0 : index
    %c0_18 = arith.constant 0 : index
    %84 = vector.load %arg10[%c0_16, %c0_17, %c0_18] : memref<2x1x32xf32, #tpu.memory_space<vmem>>, vector<1x1x32xf32>
    %85 = vector.shape_cast %84 : vector<1x1x32xf32> to vector<1x32xf32>
    %cst_19 = arith.constant dense<0.000000e+00> : vector<8xf32>
    %86 = vector.multi_reduction <add>, %78, %cst_19 [1] : vector<8x32xf32> to vector<8xf32>
    %87 = vector.shape_cast %86 : vector<8xf32> to vector<8x1xf32>
    %cst_20 = arith.constant 3.200000e+01 : f32
    %88 = vector.broadcast %cst_20 : f32 to vector<8x1xf32>
    %89 = arith.divf %87, %88 : vector<8x1xf32>
    %90 = vector.broadcast %89 : vector<8x1xf32> to vector<8x32xf32>
    %91 = arith.subf %78, %90 : vector<8x32xf32>
    %92 = arith.mulf %91, %91 : vector<8x32xf32>
    %cst_21 = arith.constant dense<0.000000e+00> : vector<8xf32>
    %93 = vector.multi_reduction <add>, %92, %cst_21 [1] : vector<8x32xf32> to vector<8xf32>
    %94 = vector.shape_cast %93 : vector<8xf32> to vector<8x1xf32>
    %cst_22 = arith.constant 3.200000e+01 : f32
    %95 = vector.broadcast %cst_22 : f32 to vector<8x1xf32>
    %96 = arith.divf %94, %95 : vector<8x1xf32>
    %97 = vector.broadcast %89 : vector<8x1xf32> to vector<8x32xf32>
    %98 = arith.subf %78, %97 : vector<8x32xf32>
    %cst_23 = arith.constant 9.99999974E-6 : f32
    %99 = vector.broadcast %cst_23 : f32 to vector<8x1xf32>
    %100 = arith.addf %96, %99 : vector<8x1xf32>
    %101 = math.rsqrt %100 : vector<8x1xf32>
    %102 = vector.broadcast %101 : vector<8x1xf32> to vector<8x32xf32>
    %103 = arith.mulf %98, %102 : vector<8x32xf32>
    %104 = vector.broadcast %83 : vector<1x32xf32> to vector<8x32xf32>
    %105 = arith.mulf %103, %104 : vector<8x32xf32>
    %106 = vector.broadcast %85 : vector<1x32xf32> to vector<8x32xf32>
    %107 = arith.addf %105, %106 : vector<8x32xf32>
    %c0_24 = arith.constant 0 : index
    %c0_25 = arith.constant 0 : index
    %c0_26 = arith.constant 0 : index
    %108 = vector.load %arg4[%c0_24, %c0_25, %c0_26] : memref<2x32x32xf32, #tpu.memory_space<vmem>>, vector<1x32x32xf32>
    %109 = vector.shape_cast %108 : vector<1x32x32xf32> to vector<32x32xf32>
    %cst_27 = arith.constant dense<0.000000e+00> : vector<8x32xf32>
    %110 = tpu.matmul %107, %109, %cst_27 {dimension_numbers = #tpu.dot_dimension_numbers<[1], [0], [0], [1], [0, 0, 1, 1], [], []>} : vector<8x32xf32>, vector<32x32xf32>, vector<8x32xf32> -> vector<8x32xf32>
    %c0_28 = arith.constant 0 : index
    %c0_29 = arith.constant 0 : index
    %c0_30 = arith.constant 0 : index
    %111 = vector.load %arg5[%c0_28, %c0_29, %c0_30] : memref<2x32x32xf32, #tpu.memory_space<vmem>>, vector<1x32x32xf32>
    %112 = vector.shape_cast %111 : vector<1x32x32xf32> to vector<32x32xf32>
    %cst_31 = arith.constant dense<0.000000e+00> : vector<8x32xf32>
    %113 = tpu.matmul %107, %112, %cst_31 {dimension_numbers = #tpu.dot_dimension_numbers<[1], [0], [0], [1], [0, 0, 1, 1], [], []>} : vector<8x32xf32>, vector<32x32xf32>, vector<8x32xf32> -> vector<8x32xf32>
    %c0_32 = arith.constant 0 : index
    %c0_33 = arith.constant 0 : index
    %c0_34 = arith.constant 0 : index
    %114 = vector.load %arg6[%c0_32, %c0_33, %c0_34] : memref<2x32x32xf32, #tpu.memory_space<vmem>>, vector<1x32x32xf32>
    %115 = vector.shape_cast %114 : vector<1x32x32xf32> to vector<32x32xf32>
    %cst_35 = arith.constant dense<0.000000e+00> : vector<8x32xf32>
    %116 = tpu.matmul %107, %115, %cst_35 {dimension_numbers = #tpu.dot_dimension_numbers<[1], [0], [0], [1], [0, 0, 1, 1], [], []>} : vector<8x32xf32>, vector<32x32xf32>, vector<8x32xf32> -> vector<8x32xf32>
    %117 = tpu.transpose %110, [1, 0] : vector<8x32xf32> -> vector<32x8xf32>
    %118 = vector.shape_cast %117 : vector<32x8xf32> to vector<4x8x8xf32>
    %119 = tpu.transpose %113, [1, 0] : vector<8x32xf32> -> vector<32x8xf32>
    %120 = vector.shape_cast %119 : vector<32x8xf32> to vector<4x8x8xf32>
    %121 = tpu.transpose %116, [1, 0] : vector<8x32xf32> -> vector<32x8xf32>
    %122 = vector.shape_cast %121 : vector<32x8xf32> to vector<4x8x8xf32>
    "tpu.trace_start"() <{level = 10 : i32, message = "hdq,hdk->hqk"}> : () -> ()
    %cst_36 = arith.constant dense<0.000000e+00> : vector<4x8x8xf32>
    %123 = tpu.matmul %118, %120, %cst_36 {dimension_numbers = #tpu.dot_dimension_numbers<[1], [1], [2], [2], [0, 0, 0, 2, 1, 2], [0], [0]>} : vector<4x8x8xf32>, vector<4x8x8xf32>, vector<4x8x8xf32> -> vector<4x8x8xf32>
    "tpu.trace_stop"() : () -> ()
    %cst_37 = arith.constant 0.353553385 : f32
    %124 = vector.broadcast %cst_37 : f32 to vector<4x8x8xf32>
    %125 = arith.mulf %123, %124 : vector<4x8x8xf32>
    %126 = vector.shape_cast %81 : vector<8x8xi1> to vector<1x8x8xi1>
    %cst_38 = arith.constant -1.000000e+30 : f32
    %127 = vector.shape_cast %126 : vector<1x8x8xi1> to vector<1x8x8xi1>
    %128 = vector.broadcast %127 : vector<1x8x8xi1> to vector<4x8x8xi1>
    %129 = vector.broadcast %cst_38 : f32 to vector<4x8x8xf32>
    %130 = arith.select %128, %125, %129 : vector<4x8x8xi1>, vector<4x8x8xf32>
    %cst_39 = arith.constant dense<0xFF800000> : vector<4x8xf32>
    %131 = vector.multi_reduction <maximumf>, %130, %cst_39 [2] : vector<4x8x8xf32> to vector<4x8xf32>
    %132 = vector.shape_cast %131 : vector<4x8xf32> to vector<4x8x1xf32>
    %133 = vector.broadcast %132 : vector<4x8x1xf32> to vector<4x8x8xf32>
    %134 = arith.subf %130, %133 : vector<4x8x8xf32>
    %135 = math.exp %134 : vector<4x8x8xf32>
    %cst_40 = arith.constant dense<0.000000e+00> : vector<4x8xf32>
    %136 = vector.multi_reduction <add>, %135, %cst_40 [2] : vector<4x8x8xf32> to vector<4x8xf32>
    %137 = vector.shape_cast %136 : vector<4x8xf32> to vector<4x8x1xf32>
    %138 = vector.broadcast %137 : vector<4x8x1xf32> to vector<4x8x8xf32>
    %139 = arith.divf %135, %138 : vector<4x8x8xf32>
    "tpu.trace_start"() <{level = 10 : i32, message = "hdk,hqk->hdq"}> : () -> ()
    %cst_41 = arith.constant dense<0.000000e+00> : vector<4x8x8xf32>
    %140 = tpu.matmul %122, %139, %cst_41 {dimension_numbers = #tpu.dot_dimension_numbers<[2], [2], [1], [1], [0, 0, 0, 1, 1, 1], [0], [0]>} : vector<4x8x8xf32>, vector<4x8x8xf32>, vector<4x8x8xf32> -> vector<4x8x8xf32>
    "tpu.trace_stop"() : () -> ()
    %141 = vector.shape_cast %140 : vector<4x8x8xf32> to vector<32x8xf32>
    %142 = tpu.transpose %141, [1, 0] : vector<32x8xf32> -> vector<8x32xf32>
    %c0_42 = arith.constant 0 : index
    %c0_43 = arith.constant 0 : index
    %c0_44 = arith.constant 0 : index
    %143 = vector.load %arg7[%c0_42, %c0_43, %c0_44] : memref<2x32x32xf32, #tpu.memory_space<vmem>>, vector<1x32x32xf32>
    %144 = vector.shape_cast %143 : vector<1x32x32xf32> to vector<32x32xf32>
    %cst_45 = arith.constant dense<0.000000e+00> : vector<8x32xf32>
    %145 = tpu.matmul %142, %144, %cst_45 {dimension_numbers = #tpu.dot_dimension_numbers<[1], [0], [0], [1], [0, 0, 1, 1], [], []>} : vector<8x32xf32>, vector<32x32xf32>, vector<8x32xf32> -> vector<8x32xf32>
    %c0_46 = arith.constant 0 : index
    %c0_47 = arith.constant 0 : index
    %c0_48 = arith.constant 0 : index
    %146 = vector.load %arg8[%c0_46, %c0_47, %c0_48] : memref<2x1x32xf32, #tpu.memory_space<vmem>>, vector<1x1x32xf32>
    %147 = vector.shape_cast %146 : vector<1x1x32xf32> to vector<1x32xf32>
    %148 = vector.broadcast %147 : vector<1x32xf32> to vector<8x32xf32>
    %149 = arith.addf %145, %148 : vector<8x32xf32>
    %150 = arith.addf %78, %149 : vector<8x32xf32>
    %c0_49 = arith.constant 0 : index
    %c0_50 = arith.constant 0 : index
    %c0_51 = arith.constant 0 : index
    %151 = vector.load %arg11[%c0_49, %c0_50, %c0_51] : memref<2x1x32xf32, #tpu.memory_space<vmem>>, vector<1x1x32xf32>
    %152 = vector.shape_cast %151 : vector<1x1x32xf32> to vector<1x32xf32>
    %c0_52 = arith.constant 0 : index
    %c0_53 = arith.constant 0 : index
    %c0_54 = arith.constant 0 : index
    %153 = vector.load %arg12[%c0_52, %c0_53, %c0_54] : memref<2x1x32xf32, #tpu.memory_space<vmem>>, vector<1x1x32xf32>
    %154 = vector.shape_cast %153 : vector<1x1x32xf32> to vector<1x32xf32>
    %cst_55 = arith.constant dense<0.000000e+00> : vector<8xf32>
    %155 = vector.multi_reduction <add>, %150, %cst_55 [1] : vector<8x32xf32> to vector<8xf32>
    %156 = vector.shape_cast %155 : vector<8xf32> to vector<8x1xf32>
    %cst_56 = arith.constant 3.200000e+01 : f32
    %157 = vector.broadcast %cst_56 : f32 to vector<8x1xf32>
    %158 = arith.divf %156, %157 : vector<8x1xf32>
    %159 = vector.broadcast %158 : vector<8x1xf32> to vector<8x32xf32>
    %160 = arith.subf %150, %159 : vector<8x32xf32>
    %161 = arith.mulf %160, %160 : vector<8x32xf32>
    %cst_57 = arith.constant dense<0.000000e+00> : vector<8xf32>
    %162 = vector.multi_reduction <add>, %161, %cst_57 [1] : vector<8x32xf32> to vector<8xf32>
    %163 = vector.shape_cast %162 : vector<8xf32> to vector<8x1xf32>
    %cst_58 = arith.constant 3.200000e+01 : f32
    %164 = vector.broadcast %cst_58 : f32 to vector<8x1xf32>
    %165 = arith.divf %163, %164 : vector<8x1xf32>
    %166 = vector.broadcast %158 : vector<8x1xf32> to vector<8x32xf32>
    %167 = arith.subf %150, %166 : vector<8x32xf32>
    %cst_59 = arith.constant 9.99999974E-6 : f32
    %168 = vector.broadcast %cst_59 : f32 to vector<8x1xf32>
    %169 = arith.addf %165, %168 : vector<8x1xf32>
    %170 = math.rsqrt %169 : vector<8x1xf32>
    %171 = vector.broadcast %170 : vector<8x1xf32> to vector<8x32xf32>
    %172 = arith.mulf %167, %171 : vector<8x32xf32>
    %173 = vector.broadcast %152 : vector<1x32xf32> to vector<8x32xf32>
    %174 = arith.mulf %172, %173 : vector<8x32xf32>
    %175 = vector.broadcast %154 : vector<1x32xf32> to vector<8x32xf32>
    %176 = arith.addf %174, %175 : vector<8x32xf32>
    %c0_60 = arith.constant 0 : index
    %c0_61 = arith.constant 0 : index
    %c0_62 = arith.constant 0 : index
    %177 = vector.load %arg13[%c0_60, %c0_61, %c0_62] : memref<2x32x128xf32, #tpu.memory_space<vmem>>, vector<1x32x128xf32>
    %178 = vector.shape_cast %177 : vector<1x32x128xf32> to vector<32x128xf32>
    %cst_63 = arith.constant dense<0.000000e+00> : vector<8x128xf32>
    %179 = tpu.matmul %176, %178, %cst_63 {dimension_numbers = #tpu.dot_dimension_numbers<[1], [0], [0], [1], [0, 0, 1, 1], [], []>} : vector<8x32xf32>, vector<32x128xf32>, vector<8x128xf32> -> vector<8x128xf32>
    %c0_64 = arith.constant 0 : index
    %c0_65 = arith.constant 0 : index
    %c0_66 = arith.constant 0 : index
    %180 = vector.load %arg14[%c0_64, %c0_65, %c0_66] : memref<2x1x128xf32, #tpu.memory_space<vmem>>, vector<1x1x128xf32>
    %181 = vector.shape_cast %180 : vector<1x1x128xf32> to vector<1x128xf32>
    %182 = vector.broadcast %181 : vector<1x128xf32> to vector<8x128xf32>
    %183 = arith.addf %179, %182 : vector<8x128xf32>
    %cst_67 = arith.constant 0.000000e+00 : f32
    %184 = vector.broadcast %cst_67 : f32 to vector<8x128xf32>
    %185 = arith.maximumf %183, %184 : vector<8x128xf32>
    %c0_68 = arith.constant 0 : index
    %c0_69 = arith.constant 0 : index
    %c0_70 = arith.constant 0 : index
    %186 = vector.load %arg15[%c0_68, %c0_69, %c0_70] : memref<2x128x32xf32, #tpu.memory_space<vmem>>, vector<1x128x32xf32>
    %187 = vector.shape_cast %186 : vector<1x128x32xf32> to vector<128x32xf32>
    %cst_71 = arith.constant dense<0.000000e+00> : vector<8x32xf32>
    %188 = tpu.matmul %185, %187, %cst_71 {dimension_numbers = #tpu.dot_dimension_numbers<[1], [0], [0], [1], [0, 0, 1, 1], [], []>} : vector<8x128xf32>, vector<128x32xf32>, vector<8x32xf32> -> vector<8x32xf32>
    %c0_72 = arith.constant 0 : index
    %c0_73 = arith.constant 0 : index
    %c0_74 = arith.constant 0 : index
    %189 = vector.load %arg16[%c0_72, %c0_73, %c0_74] : memref<2x1x32xf32, #tpu.memory_space<vmem>>, vector<1x1x32xf32>
    %190 = vector.shape_cast %189 : vector<1x1x32xf32> to vector<1x32xf32>
    %191 = vector.broadcast %190 : vector<1x32xf32> to vector<8x32xf32>
    %192 = arith.addf %188, %191 : vector<8x32xf32>
    %193 = arith.addf %150, %192 : vector<8x32xf32>
    %c1_75 = arith.constant 1 : index
    %c0_76 = arith.constant 0 : index
    %c0_77 = arith.constant 0 : index
    %194 = vector.load %arg9[%c1_75, %c0_76, %c0_77] : memref<2x1x32xf32, #tpu.memory_space<vmem>>, vector<1x1x32xf32>
    %195 = vector.shape_cast %194 : vector<1x1x32xf32> to vector<1x32xf32>
    %c1_78 = arith.constant 1 : index
    %c0_79 = arith.constant 0 : index
    %c0_80 = arith.constant 0 : index
    %196 = vector.load %arg10[%c1_78, %c0_79, %c0_80] : memref<2x1x32xf32, #tpu.memory_space<vmem>>, vector<1x1x32xf32>
    %197 = vector.shape_cast %196 : vector<1x1x32xf32> to vector<1x32xf32>
    %cst_81 = arith.constant dense<0.000000e+00> : vector<8xf32>
    %198 = vector.multi_reduction <add>, %193, %cst_81 [1] : vector<8x32xf32> to vector<8xf32>
    %199 = vector.shape_cast %198 : vector<8xf32> to vector<8x1xf32>
    %cst_82 = arith.constant 3.200000e+01 : f32
    %200 = vector.broadcast %cst_82 : f32 to vector<8x1xf32>
    %201 = arith.divf %199, %200 : vector<8x1xf32>
    %202 = vector.broadcast %201 : vector<8x1xf32> to vector<8x32xf32>
    %203 = arith.subf %193, %202 : vector<8x32xf32>
    %204 = arith.mulf %203, %203 : vector<8x32xf32>
    %cst_83 = arith.constant dense<0.000000e+00> : vector<8xf32>
    %205 = vector.multi_reduction <add>, %204, %cst_83 [1] : vector<8x32xf32> to vector<8xf32>
    %206 = vector.shape_cast %205 : vector<8xf32> to vector<8x1xf32>
    %cst_84 = arith.constant 3.200000e+01 : f32
    %207 = vector.broadcast %cst_84 : f32 to vector<8x1xf32>
    %208 = arith.divf %206, %207 : vector<8x1xf32>
    %209 = vector.broadcast %201 : vector<8x1xf32> to vector<8x32xf32>
    %210 = arith.subf %193, %209 : vector<8x32xf32>
    %cst_85 = arith.constant 9.99999974E-6 : f32
    %211 = vector.broadcast %cst_85 : f32 to vector<8x1xf32>
    %212 = arith.addf %208, %211 : vector<8x1xf32>
    %213 = math.rsqrt %212 : vector<8x1xf32>
    %214 = vector.broadcast %213 : vector<8x1xf32> to vector<8x32xf32>
    %215 = arith.mulf %210, %214 : vector<8x32xf32>
    %216 = vector.broadcast %195 : vector<1x32xf32> to vector<8x32xf32>
    %217 = arith.mulf %215, %216 : vector<8x32xf32>
    %218 = vector.broadcast %197 : vector<1x32xf32> to vector<8x32xf32>
    %219 = arith.addf %217, %218 : vector<8x32xf32>
    %c1_86 = arith.constant 1 : index
    %c0_87 = arith.constant 0 : index
    %c0_88 = arith.constant 0 : index
    %220 = vector.load %arg4[%c1_86, %c0_87, %c0_88] : memref<2x32x32xf32, #tpu.memory_space<vmem>>, vector<1x32x32xf32>
    %221 = vector.shape_cast %220 : vector<1x32x32xf32> to vector<32x32xf32>
    %cst_89 = arith.constant dense<0.000000e+00> : vector<8x32xf32>
    %222 = tpu.matmul %219, %221, %cst_89 {dimension_numbers = #tpu.dot_dimension_numbers<[1], [0], [0], [1], [0, 0, 1, 1], [], []>} : vector<8x32xf32>, vector<32x32xf32>, vector<8x32xf32> -> vector<8x32xf32>
    %c1_90 = arith.constant 1 : index
    %c0_91 = arith.constant 0 : index
    %c0_92 = arith.constant 0 : index
    %223 = vector.load %arg5[%c1_90, %c0_91, %c0_92] : memref<2x32x32xf32, #tpu.memory_space<vmem>>, vector<1x32x32xf32>
    %224 = vector.shape_cast %223 : vector<1x32x32xf32> to vector<32x32xf32>
    %cst_93 = arith.constant dense<0.000000e+00> : vector<8x32xf32>
    %225 = tpu.matmul %219, %224, %cst_93 {dimension_numbers = #tpu.dot_dimension_numbers<[1], [0], [0], [1], [0, 0, 1, 1], [], []>} : vector<8x32xf32>, vector<32x32xf32>, vector<8x32xf32> -> vector<8x32xf32>
    %c1_94 = arith.constant 1 : index
    %c0_95 = arith.constant 0 : index
    %c0_96 = arith.constant 0 : index
    %226 = vector.load %arg6[%c1_94, %c0_95, %c0_96] : memref<2x32x32xf32, #tpu.memory_space<vmem>>, vector<1x32x32xf32>
    %227 = vector.shape_cast %226 : vector<1x32x32xf32> to vector<32x32xf32>
    %cst_97 = arith.constant dense<0.000000e+00> : vector<8x32xf32>
    %228 = tpu.matmul %219, %227, %cst_97 {dimension_numbers = #tpu.dot_dimension_numbers<[1], [0], [0], [1], [0, 0, 1, 1], [], []>} : vector<8x32xf32>, vector<32x32xf32>, vector<8x32xf32> -> vector<8x32xf32>
    %229 = tpu.transpose %222, [1, 0] : vector<8x32xf32> -> vector<32x8xf32>
    %230 = vector.shape_cast %229 : vector<32x8xf32> to vector<4x8x8xf32>
    %231 = tpu.transpose %225, [1, 0] : vector<8x32xf32> -> vector<32x8xf32>
    %232 = vector.shape_cast %231 : vector<32x8xf32> to vector<4x8x8xf32>
    %233 = tpu.transpose %228, [1, 0] : vector<8x32xf32> -> vector<32x8xf32>
    %234 = vector.shape_cast %233 : vector<32x8xf32> to vector<4x8x8xf32>
    "tpu.trace_start"() <{level = 10 : i32, message = "hdq,hdk->hqk"}> : () -> ()
    %cst_98 = arith.constant dense<0.000000e+00> : vector<4x8x8xf32>
    %235 = tpu.matmul %230, %232, %cst_98 {dimension_numbers = #tpu.dot_dimension_numbers<[1], [1], [2], [2], [0, 0, 0, 2, 1, 2], [0], [0]>} : vector<4x8x8xf32>, vector<4x8x8xf32>, vector<4x8x8xf32> -> vector<4x8x8xf32>
    "tpu.trace_stop"() : () -> ()
    %cst_99 = arith.constant 0.353553385 : f32
    %236 = vector.broadcast %cst_99 : f32 to vector<4x8x8xf32>
    %237 = arith.mulf %235, %236 : vector<4x8x8xf32>
    %238 = vector.shape_cast %81 : vector<8x8xi1> to vector<1x8x8xi1>
    %cst_100 = arith.constant -1.000000e+30 : f32
    %239 = vector.shape_cast %238 : vector<1x8x8xi1> to vector<1x8x8xi1>
    %240 = vector.broadcast %239 : vector<1x8x8xi1> to vector<4x8x8xi1>
    %241 = vector.broadcast %cst_100 : f32 to vector<4x8x8xf32>
    %242 = arith.select %240, %237, %241 : vector<4x8x8xi1>, vector<4x8x8xf32>
    %cst_101 = arith.constant dense<0xFF800000> : vector<4x8xf32>
    %243 = vector.multi_reduction <maximumf>, %242, %cst_101 [2] : vector<4x8x8xf32> to vector<4x8xf32>
    %244 = vector.shape_cast %243 : vector<4x8xf32> to vector<4x8x1xf32>
    %245 = vector.broadcast %244 : vector<4x8x1xf32> to vector<4x8x8xf32>
    %246 = arith.subf %242, %245 : vector<4x8x8xf32>
    %247 = math.exp %246 : vector<4x8x8xf32>
    %cst_102 = arith.constant dense<0.000000e+00> : vector<4x8xf32>
    %248 = vector.multi_reduction <add>, %247, %cst_102 [2] : vector<4x8x8xf32> to vector<4x8xf32>
    %249 = vector.shape_cast %248 : vector<4x8xf32> to vector<4x8x1xf32>
    %250 = vector.broadcast %249 : vector<4x8x1xf32> to vector<4x8x8xf32>
    %251 = arith.divf %247, %250 : vector<4x8x8xf32>
    "tpu.trace_start"() <{level = 10 : i32, message = "hdk,hqk->hdq"}> : () -> ()
    %cst_103 = arith.constant dense<0.000000e+00> : vector<4x8x8xf32>
    %252 = tpu.matmul %234, %251, %cst_103 {dimension_numbers = #tpu.dot_dimension_numbers<[2], [2], [1], [1], [0, 0, 0, 1, 1, 1], [0], [0]>} : vector<4x8x8xf32>, vector<4x8x8xf32>, vector<4x8x8xf32> -> vector<4x8x8xf32>
    "tpu.trace_stop"() : () -> ()
    %253 = vector.shape_cast %252 : vector<4x8x8xf32> to vector<32x8xf32>
    %254 = tpu.transpose %253, [1, 0] : vector<32x8xf32> -> vector<8x32xf32>
    %c1_104 = arith.constant 1 : index
    %c0_105 = arith.constant 0 : index
    %c0_106 = arith.constant 0 : index
    %255 = vector.load %arg7[%c1_104, %c0_105, %c0_106] : memref<2x32x32xf32, #tpu.memory_space<vmem>>, vector<1x32x32xf32>
    %256 = vector.shape_cast %255 : vector<1x32x32xf32> to vector<32x32xf32>
    %cst_107 = arith.constant dense<0.000000e+00> : vector<8x32xf32>
    %257 = tpu.matmul %254, %256, %cst_107 {dimension_numbers = #tpu.dot_dimension_numbers<[1], [0], [0], [1], [0, 0, 1, 1], [], []>} : vector<8x32xf32>, vector<32x32xf32>, vector<8x32xf32> -> vector<8x32xf32>
    %c1_108 = arith.constant 1 : index
    %c0_109 = arith.constant 0 : index
    %c0_110 = arith.constant 0 : index
    %258 = vector.load %arg8[%c1_108, %c0_109, %c0_110] : memref<2x1x32xf32, #tpu.memory_space<vmem>>, vector<1x1x32xf32>
    %259 = vector.shape_cast %258 : vector<1x1x32xf32> to vector<1x32xf32>
    %260 = vector.broadcast %259 : vector<1x32xf32> to vector<8x32xf32>
    %261 = arith.addf %257, %260 : vector<8x32xf32>
    %262 = arith.addf %193, %261 : vector<8x32xf32>
    %c1_111 = arith.constant 1 : index
    %c0_112 = arith.constant 0 : index
    %c0_113 = arith.constant 0 : index
    %263 = vector.load %arg11[%c1_111, %c0_112, %c0_113] : memref<2x1x32xf32, #tpu.memory_space<vmem>>, vector<1x1x32xf32>
    %264 = vector.shape_cast %263 : vector<1x1x32xf32> to vector<1x32xf32>
    %c1_114 = arith.constant 1 : index
    %c0_115 = arith.constant 0 : index
    %c0_116 = arith.constant 0 : index
    %265 = vector.load %arg12[%c1_114, %c0_115, %c0_116] : memref<2x1x32xf32, #tpu.memory_space<vmem>>, vector<1x1x32xf32>
    %266 = vector.shape_cast %265 : vector<1x1x32xf32> to vector<1x32xf32>
    %cst_117 = arith.constant dense<0.000000e+00> : vector<8xf32>
    %267 = vector.multi_reduction <add>, %262, %cst_117 [1] : vector<8x32xf32> to vector<8xf32>
    %268 = vector.shape_cast %267 : vector<8xf32> to vector<8x1xf32>
    %cst_118 = arith.constant 3.200000e+01 : f32
    %269 = vector.broadcast %cst_118 : f32 to vector<8x1xf32>
    %270 = arith.divf %268, %269 : vector<8x1xf32>
    %271 = vector.broadcast %270 : vector<8x1xf32> to vector<8x32xf32>
    %272 = arith.subf %262, %271 : vector<8x32xf32>
    %273 = arith.mulf %272, %272 : vector<8x32xf32>
    %cst_119 = arith.constant dense<0.000000e+00> : vector<8xf32>
    %274 = vector.multi_reduction <add>, %273, %cst_119 [1] : vector<8x32xf32> to vector<8xf32>
    %275 = vector.shape_cast %274 : vector<8xf32> to vector<8x1xf32>
    %cst_120 = arith.constant 3.200000e+01 : f32
    %276 = vector.broadcast %cst_120 : f32 to vector<8x1xf32>
    %277 = arith.divf %275, %276 : vector<8x1xf32>
    %278 = vector.broadcast %270 : vector<8x1xf32> to vector<8x32xf32>
    %279 = arith.subf %262, %278 : vector<8x32xf32>
    %cst_121 = arith.constant 9.99999974E-6 : f32
    %280 = vector.broadcast %cst_121 : f32 to vector<8x1xf32>
    %281 = arith.addf %277, %280 : vector<8x1xf32>
    %282 = math.rsqrt %281 : vector<8x1xf32>
    %283 = vector.broadcast %282 : vector<8x1xf32> to vector<8x32xf32>
    %284 = arith.mulf %279, %283 : vector<8x32xf32>
    %285 = vector.broadcast %264 : vector<1x32xf32> to vector<8x32xf32>
    %286 = arith.mulf %284, %285 : vector<8x32xf32>
    %287 = vector.broadcast %266 : vector<1x32xf32> to vector<8x32xf32>
    %288 = arith.addf %286, %287 : vector<8x32xf32>
    %c1_122 = arith.constant 1 : index
    %c0_123 = arith.constant 0 : index
    %c0_124 = arith.constant 0 : index
    %289 = vector.load %arg13[%c1_122, %c0_123, %c0_124] : memref<2x32x128xf32, #tpu.memory_space<vmem>>, vector<1x32x128xf32>
    %290 = vector.shape_cast %289 : vector<1x32x128xf32> to vector<32x128xf32>
    %cst_125 = arith.constant dense<0.000000e+00> : vector<8x128xf32>
    %291 = tpu.matmul %288, %290, %cst_125 {dimension_numbers = #tpu.dot_dimension_numbers<[1], [0], [0], [1], [0, 0, 1, 1], [], []>} : vector<8x32xf32>, vector<32x128xf32>, vector<8x128xf32> -> vector<8x128xf32>
    %c1_126 = arith.constant 1 : index
    %c0_127 = arith.constant 0 : index
    %c0_128 = arith.constant 0 : index
    %292 = vector.load %arg14[%c1_126, %c0_127, %c0_128] : memref<2x1x128xf32, #tpu.memory_space<vmem>>, vector<1x1x128xf32>
    %293 = vector.shape_cast %292 : vector<1x1x128xf32> to vector<1x128xf32>
    %294 = vector.broadcast %293 : vector<1x128xf32> to vector<8x128xf32>
    %295 = arith.addf %291, %294 : vector<8x128xf32>
    %cst_129 = arith.constant 0.000000e+00 : f32
    %296 = vector.broadcast %cst_129 : f32 to vector<8x128xf32>
    %297 = arith.maximumf %295, %296 : vector<8x128xf32>
    %c1_130 = arith.constant 1 : index
    %c0_131 = arith.constant 0 : index
    %c0_132 = arith.constant 0 : index
    %298 = vector.load %arg15[%c1_130, %c0_131, %c0_132] : memref<2x128x32xf32, #tpu.memory_space<vmem>>, vector<1x128x32xf32>
    %299 = vector.shape_cast %298 : vector<1x128x32xf32> to vector<128x32xf32>
    %cst_133 = arith.constant dense<0.000000e+00> : vector<8x32xf32>
    %300 = tpu.matmul %297, %299, %cst_133 {dimension_numbers = #tpu.dot_dimension_numbers<[1], [0], [0], [1], [0, 0, 1, 1], [], []>} : vector<8x128xf32>, vector<128x32xf32>, vector<8x32xf32> -> vector<8x32xf32>
    %c1_134 = arith.constant 1 : index
    %c0_135 = arith.constant 0 : index
    %c0_136 = arith.constant 0 : index
    %301 = vector.load %arg16[%c1_134, %c0_135, %c0_136] : memref<2x1x32xf32, #tpu.memory_space<vmem>>, vector<1x1x32xf32>
    %302 = vector.shape_cast %301 : vector<1x1x32xf32> to vector<1x32xf32>
    %303 = vector.broadcast %302 : vector<1x32xf32> to vector<8x32xf32>
    %304 = arith.addf %300, %303 : vector<8x32xf32>
    %305 = arith.addf %262, %304 : vector<8x32xf32>
    %c0_137 = arith.constant 0 : index
    %c0_138 = arith.constant 0 : index
    %306 = vector.load %arg17[%c0_137, %c0_138] : memref<1x32xf32, #tpu.memory_space<vmem>>, vector<1x32xf32>
    %c0_139 = arith.constant 0 : index
    %c0_140 = arith.constant 0 : index
    %307 = vector.load %arg18[%c0_139, %c0_140] : memref<1x32xf32, #tpu.memory_space<vmem>>, vector<1x32xf32>
    %cst_141 = arith.constant dense<0.000000e+00> : vector<8xf32>
    %308 = vector.multi_reduction <add>, %305, %cst_141 [1] : vector<8x32xf32> to vector<8xf32>
    %309 = vector.shape_cast %308 : vector<8xf32> to vector<8x1xf32>
    %cst_142 = arith.constant 3.200000e+01 : f32
    %310 = vector.broadcast %cst_142 : f32 to vector<8x1xf32>
    %311 = arith.divf %309, %310 : vector<8x1xf32>
    %312 = vector.broadcast %311 : vector<8x1xf32> to vector<8x32xf32>
    %313 = arith.subf %305, %312 : vector<8x32xf32>
    %314 = arith.mulf %313, %313 : vector<8x32xf32>
    %cst_143 = arith.constant dense<0.000000e+00> : vector<8xf32>
    %315 = vector.multi_reduction <add>, %314, %cst_143 [1] : vector<8x32xf32> to vector<8xf32>
    %316 = vector.shape_cast %315 : vector<8xf32> to vector<8x1xf32>
    %cst_144 = arith.constant 3.200000e+01 : f32
    %317 = vector.broadcast %cst_144 : f32 to vector<8x1xf32>
    %318 = arith.divf %316, %317 : vector<8x1xf32>
    %319 = vector.broadcast %311 : vector<8x1xf32> to vector<8x32xf32>
    %320 = arith.subf %305, %319 : vector<8x32xf32>
    %cst_145 = arith.constant 9.99999974E-6 : f32
    %321 = vector.broadcast %cst_145 : f32 to vector<8x1xf32>
    %322 = arith.addf %318, %321 : vector<8x1xf32>
    %323 = math.rsqrt %322 : vector<8x1xf32>
    %324 = vector.broadcast %323 : vector<8x1xf32> to vector<8x32xf32>
    %325 = arith.mulf %320, %324 : vector<8x32xf32>
    %326 = vector.broadcast %306 : vector<1x32xf32> to vector<8x32xf32>
    %327 = arith.mulf %325, %326 : vector<8x32xf32>
    %328 = vector.broadcast %307 : vector<1x32xf32> to vector<8x32xf32>
    %329 = arith.addf %327, %328 : vector<8x32xf32>
    %c0_146 = arith.constant 0 : index
    %c0_147 = arith.constant 0 : index
    %330 = vector.load %arg19[%c0_146, %c0_147] : memref<32x128xf32, #tpu.memory_space<vmem>>, vector<32x128xf32>
    %cst_148 = arith.constant dense<0.000000e+00> : vector<8x128xf32>
    %331 = tpu.matmul %329, %330, %cst_148 {dimension_numbers = #tpu.dot_dimension_numbers<[1], [0], [0], [1], [0, 0, 1, 1], [], []>} : vector<8x32xf32>, vector<32x128xf32>, vector<8x128xf32> -> vector<8x128xf32>
    %c0_149 = arith.constant 0 : index
    %c0_150 = arith.constant 0 : index
    %332 = vector.load %arg20[%c0_149, %c0_150] : memref<1x128xf32, #tpu.memory_space<vmem>>, vector<1x128xf32>
    %333 = vector.broadcast %332 : vector<1x128xf32> to vector<8x128xf32>
    %334 = arith.addf %331, %333 : vector<8x128xf32>
    %335 = vector.shape_cast %334 : vector<8x128xf32> to vector<1x8x128xf32>
    %c0_151 = arith.constant 0 : index
    %c0_152 = arith.constant 0 : index
    %c0_153 = arith.constant 0 : index
    %336 = vector.load %arg21[%c0_151, %c0_152, %c0_153] : memref<1x8x128xf32, #tpu.memory_space<vmem>>, vector<1x8x128xf32>
    tpu.vector_store %arg21[%c0_151, %c0_152, %c0_153], %335 {strides = array<i32>} : memref<1x8x128xf32, #tpu.memory_space<vmem>>, vector<1x8x128xf32>,
    return
  }
  func.func @transform_0(%arg0: i32, %arg1: memref<2x8xi32, #tpu.memory_space<smem>>) -> (i32, i32) {
    %c0_i32 = arith.constant 0 : i32
    %c0_i32_0 = arith.constant 0 : i32
    %c0_i32_1 = arith.constant 0 : i32
    return %c0_i32, %c0_i32_0 : i32, i32
  }
  func.func @transform_1(%arg0: i32, %arg1: memref<2x8xi32, #tpu.memory_space<smem>>) -> (i32, i32) {
    %c0_i32 = arith.constant 0 : i32
    %c0_i32_0 = arith.constant 0 : i32
    %c0_i32_1 = arith.constant 0 : i32
    return %c0_i32, %c0_i32_0 : i32, i32
  }
  func.func @transform_2(%arg0: i32, %arg1: memref<2x8xi32, #tpu.memory_space<smem>>) -> (i32, i32, i32) {
    %c0_i32 = arith.constant 0 : i32
    %c0_i32_0 = arith.constant 0 : i32
    %c0_i32_1 = arith.constant 0 : i32
    %c0_i32_2 = arith.constant 0 : i32
    return %c0_i32, %c0_i32_0, %c0_i32_1 : i32, i32, i32
  }
  func.func @transform_3(%arg0: i32, %arg1: memref<2x8xi32, #tpu.memory_space<smem>>) -> (i32, i32, i32) {
    %c0_i32 = arith.constant 0 : i32
    %c0_i32_0 = arith.constant 0 : i32
    %c0_i32_1 = arith.constant 0 : i32
    %c0_i32_2 = arith.constant 0 : i32
    return %c0_i32, %c0_i32_0, %c0_i32_1 : i32, i32, i32
  }
  func.func @transform_4(%arg0: i32, %arg1: memref<2x8xi32, #tpu.memory_space<smem>>) -> (i32, i32, i32) {
    %c0_i32 = arith.constant 0 : i32
    %c0_i32_0 = arith.constant 0 : i32
    %c0_i32_1 = arith.constant 0 : i32
    %c0_i32_2 = arith.constant 0 : i32
    return %c0_i32, %c0_i32_0, %c0_i32_1 : i32, i32, i32
  }
  func.func @transform_5(%arg0: i32, %arg1: memref<2x8xi32, #tpu.memory_space<smem>>) -> (i32, i32, i32) {
    %c0_i32 = arith.constant 0 : i32
    %c0_i32_0 = arith.constant 0 : i32
    %c0_i32_1 = arith.constant 0 : i32
    %c0_i32_2 = arith.constant 0 : i32
    return %c0_i32, %c0_i32_0, %c0_i32_1 : i32, i32, i32
  }
  func.func @transform_6(%arg0: i32, %arg1: memref<2x8xi32, #tpu.memory_space<smem>>) -> (i32, i32, i32) {
    %c0_i32 = arith.constant 0 : i32
    %c0_i32_0 = arith.constant 0 : i32
    %c0_i32_1 = arith.constant 0 : i32
    %c0_i32_2 = arith.constant 0 : i32
    return %c0_i32, %c0_i32_0, %c0_i32_1 : i32, i32, i32
  }
  func.func @transform_7(%arg0: i32, %arg1: memref<2x8xi32, #tpu.memory_space<smem>>) -> (i32, i32, i32) {
    %c0_i32 = arith.constant 0 : i32
    %c0_i32_0 = arith.constant 0 : i32
    %c0_i32_1 = arith.constant 0 : i32
    %c0_i32_2 = arith.constant 0 : i32
    return %c0_i32, %c0_i32_0, %c0_i32_1 : i32, i32, i32
  }
  func.func @transform_8(%arg0: i32, %arg1: memref<2x8xi32, #tpu.memory_space<smem>>) -> (i32, i32, i32) {
    %c0_i32 = arith.constant 0 : i32
    %c0_i32_0 = arith.constant 0 : i32
    %c0_i32_1 = arith.constant 0 : i32
    %c0_i32_2 = arith.constant 0 : i32
    return %c0_i32, %c0_i32_0, %c0_i32_1 : i32, i32, i32
  }
  func.func @transform_9(%arg0: i32, %arg1: memref<2x8xi32, #tpu.memory_space<smem>>) -> (i32, i32, i32) {
    %c0_i32 = arith.constant 0 : i32
    %c0_i32_0 = arith.constant 0 : i32
    %c0_i32_1 = arith.constant 0 : i32
    %c0_i32_2 = arith.constant 0 : i32
    return %c0_i32, %c0_i32_0, %c0_i32_1 : i32, i32, i32
  }
  func.func @transform_10(%arg0: i32, %arg1: memref<2x8xi32, #tpu.memory_space<smem>>) -> (i32, i32, i32) {
    %c0_i32 = arith.constant 0 : i32
    %c0_i32_0 = arith.constant 0 : i32
    %c0_i32_1 = arith.constant 0 : i32
    %c0_i32_2 = arith.constant 0 : i32
    return %c0_i32, %c0_i32_0, %c0_i32_1 : i32, i32, i32
  }
  func.func @transform_11(%arg0: i32, %arg1: memref<2x8xi32, #tpu.memory_space<smem>>) -> (i32, i32, i32) {
    %c0_i32 = arith.constant 0 : i32
    %c0_i32_0 = arith.constant 0 : i32
    %c0_i32_1 = arith.constant 0 : i32
    %c0_i32_2 = arith.constant 0 : i32
    return %c0_i32, %c0_i32_0, %c0_i32_1 : i32, i32, i32
  }
  func.func @transform_12(%arg0: i32, %arg1: memref<2x8xi32, #tpu.memory_space<smem>>) -> (i32, i32, i32) {
    %c0_i32 = arith.constant 0 : i32
    %c0_i32_0 = arith.constant 0 : i32
    %c0_i32_1 = arith.constant 0 : i32
    %c0_i32_2 = arith.constant 0 : i32
    return %c0_i32, %c0_i32_0, %c0_i32_1 : i32, i32, i32
  }
  func.func @transform_13(%arg0: i32, %arg1: memref<2x8xi32, #tpu.memory_space<smem>>) -> (i32, i32, i32) {
    %c0_i32 = arith.constant 0 : i32
    %c0_i32_0 = arith.constant 0 : i32
    %c0_i32_1 = arith.constant 0 : i32
    %c0_i32_2 = arith.constant 0 : i32
    return %c0_i32, %c0_i32_0, %c0_i32_1 : i32, i32, i32
  }
  func.func @transform_14(%arg0: i32, %arg1: memref<2x8xi32, #tpu.memory_space<smem>>) -> (i32, i32, i32) {
    %c0_i32 = arith.constant 0 : i32
    %c0_i32_0 = arith.constant 0 : i32
    %c0_i32_1 = arith.constant 0 : i32
    %c0_i32_2 = arith.constant 0 : i32
    return %c0_i32, %c0_i32_0, %c0_i32_1 : i32, i32, i32
  }
  func.func @transform_15(%arg0: i32, %arg1: memref<2x8xi32, #tpu.memory_space<smem>>) -> (i32, i32) {
    %c0_i32 = arith.constant 0 : i32
    %c0_i32_0 = arith.constant 0 : i32
    %c0_i32_1 = arith.constant 0 : i32
    return %c0_i32, %c0_i32_0 : i32, i32
  }
  func.func @transform_16(%arg0: i32, %arg1: memref<2x8xi32, #tpu.memory_space<smem>>) -> (i32, i32) {
    %c0_i32 = arith.constant 0 : i32
    %c0_i32_0 = arith.constant 0 : i32
    %c0_i32_1 = arith.constant 0 : i32
    return %c0_i32, %c0_i32_0 : i32, i32
  }
  func.func @transform_17(%arg0: i32, %arg1: memref<2x8xi32, #tpu.memory_space<smem>>) -> (i32, i32) {
    %c0_i32 = arith.constant 0 : i32
    %c0_i32_0 = arith.constant 0 : i32
    %c0_i32_1 = arith.constant 0 : i32
    return %c0_i32, %c0_i32_0 : i32, i32
  }
  func.func @transform_18(%arg0: i32, %arg1: memref<2x8xi32, #tpu.memory_space<smem>>) -> (i32, i32) {
    %c0_i32 = arith.constant 0 : i32
    %c0_i32_0 = arith.constant 0 : i32
    %c0_i32_1 = arith.constant 0 : i32
    return %c0_i32, %c0_i32_0 : i32, i32
  }
  func.func @transform_19(%arg0: i32, %arg1: memref<2x8xi32, #tpu.memory_space<smem>>) -> (i32, i32, i32) {
    %c0_i32 = arith.constant 0 : i32
    %c0_i32_0 = arith.constant 0 : i32
    %c0_i32_1 = arith.constant 0 : i32
    return %arg0, %c0_i32, %c0_i32_0 : i32, i32, i32
  }
}

</mosaic_0001>

<bundles_post_ra>
// kernel: gpt_forward.1
= control target key start
LH: loop header
LB: loop body
LE: loop exit
PB: predicated region body
PF: predicated region fallthrough
CT: control target
= control target key end

     0   :  { %s5500_s0 = inlined_call_operand.vmem [shape: s32[2,8], index: 0, kind: input, shape index: {}]   ;;  %s5501_s1 = inlined_call_operand.vmem [shape: f32[128,32], index: 1, kind: input, shape index: {}]   ;;  %s5502_s2 = inlined_call_operand.vmem [shape: f32[8,32], index: 2, kind: input, shape index: {}]   ;;  %s5503_s3 = inlined_call_operand.vmem [shape: f32[2,32,32], index: 3, kind: input, shape index: {}]   ;;  %s5504_s4 = inlined_call_operand.vmem [shape: f32[2,32,32], index: 4, kind: input, shape index: {}]   ;;  %s5505_s5 = inlined_call_operand.vmem [shape: f32[2,32,32], index: 5, kind: input, shape index: {}]   ;;  %s5506_s6 = inlined_call_operand.vmem [shape: f32[2,32,32], index: 6, kind: input, shape index: {}]   ;;  %s5507_s7 = inlined_call_operand.vmem [shape: f32[2,1,32], index: 7, kind: input, shape index: {}]   ;;  %s5508_s8 = inlined_call_operand.vmem [shape: f32[2,1,32], index: 8, kind: input, shape index: {}]   ;;  %s5509_s9 = inlined_call_operand.vmem [shape: f32[2,1,32], index: 9, kind: input, shape index: {}]   ;;  %s5510_s10 = inlined_call_operand.vmem [shape: f32[2,1,32], index: 10, kind: input, shape index: {}]   ;;  %s5511_s11 = inlined_call_operand.vmem [shape: f32[2,1,32], index: 11, kind: input, shape index: {}]   ;;  %s5512_s12 = inlined_call_operand.vmem [shape: f32[2,32,128], index: 12, kind: input, shape index: {}]   ;;  %s5513_s13 = inlined_call_operand.vmem [shape: f32[2,1,128], index: 13, kind: input, shape index: {}]   ;;  %s5514_s14 = inlined_call_operand.vmem [shape: f32[2,128,32], index: 14, kind: input, shape index: {}]   ;;  %s5515_s15 = inlined_call_operand.vmem [shape: f32[2,1,32], index: 15, kind: input, shape index: {}]   ;;  %s5516_s16 = inlined_call_operand.vmem [shape: f32[1,32], index: 16, kind: input, shape index: {}]   ;;  %s5517_s17 = inlined_call_operand.vmem [shape: f32[1,32], index: 17, kind: input, shape index: {}]   ;;  %s5518_s18 = inlined_call_operand.vmem [shape: f32[32,128], index: 18, kind: input, shape index: {}]   ;;  %s5519_s19 = inlined_call_operand.vmem [shape: f32[1,128], index: 19, kind: input, shape index: {}]   ;;  %s5520_s20 = inlined_call_operand.hbm [shape: f32[2,8,128], index: 20, kind: output, shape index: {}]  }
   0x1   :  { %5532 = sst [smem:[#allocation14_spill]] %s5500_s0 }
   0x2   :  { %5533 = sst [smem:[#allocation15_spill]] %s5501_s1  ;;  %s5542_s23 = sld [smem:[#allocation14_spill]] }
   0x3   :  { %5534 = sst [smem:[#allocation16_spill]] %s5502_s2 }
   0x4   :  { %5535 = sst [smem:[#allocation17_spill]] %s5503_s3 }
   0x5   :  { %5536 = sst [smem:[#allocation18_spill]] %s5504_s4 }
   0x6   :  { %5537 = sst [smem:[#allocation19_spill]] %s5505_s5 }
   0x7   :  { %5538 = sst [smem:[#allocation20_spill]] %s5506_s6 }
   0x8   :  { %5539 = sst [smem:[#allocation21_spill]] %s5507_s7 }
   0x9   :  { %5540 = sst [smem:[#allocation22_spill]] %s5513_s13  ;;  %s25_s13 = sshll.u32 %s5542_s23, 4  ;;  %s26_s13 = int_to_ptr.vmem [resolvable:$true] %s25_s13 }
   0xa   :  { %5541 = sst [smem:[#allocation23_spill]] %s5520_s20  ;;  %s4602_s24 = scalar_lea.vmem %s26_s13, 32 }
   0xb   :  { %p4603_p0 = scmp.ne.s32.totalorder %s26_s13, %s4602_s24  ;;  %p4607_p1 = scmp.lt.s32.totalorder %s26_s13, %s26_s13 }
   0xc   :  { %p4608_p2 = scmp.lt.s32.totalorder %s4602_s24, %s4602_s24 }
   0xe   :  { %p4609_p3 = por %p4608_p2, %p4607_p1 }
  0x10   :  { %p4610_p4 = pnand %p4609_p3, %p4603_p0 }
  0x12   :  { %4613 = shalt.err (!%p4610_p4)  }
  0x13   :  { %s4680_s2 = smov [#allocation3]  }
  0x14   :  { %28 = dma.vmem_to_smem %s26_s13, 32, %s4680_s2, [#allocation2] }
  0x15   :  { %4658 = dma.done.wait [#allocation2], 32 }
  0x16   :  { %4659 = vsyncadd [#allocation2], 4294967264 }
  0x17   :  { %30 = sfence }
  0x18   :  { %31 = vsyncpa [#allocation5], 0 }
  0x19   :  { %33 = vsyncpa [#allocation5 + $0x1], 0  ;;  %s4793_s25 = smov 0   ;;  %s4795_s3 = smov 0  }
  0x1a   :  { %s4797_s26 = smov 0   ;;  %s4799_s27 = smov 0  }
  0x1b LB: > { %5543 = sst [smem:[#allocation8_spill]] %s4666_s25  ;;  %s3830_s13 = sadd.s32 4294967295, %s4678_s27   ;;  %s4678_s27 = sphi %s4799_s27, %s5569_s27   ;;  %s4674_s26 = sphi %s4797_s26, %s5571_s26   ;;  %s4670_s3 = sphi %s4795_s3, %s5573_s3   ;;  %s4666_s25 = sphi %s4793_s25, %s5572_s25  }
  0x1c   : > { %5544 = sst [smem:[#allocation9_spill]] %s4674_s26  ;;  %s3831_s28 = sadd.s32 4294967294, %s4678_s27  }
  0x1d   : > { %5545 = sst [smem:[#allocation10_spill]] %s4678_s27  ;;  %s4816_s4 = sadd.s32 1, %s4678_s27  }
  0x1e   : > { %5546 = sst [smem:[#allocation11_spill]] %s4816_s4  ;;  %s445_s29 = sadd.s32 1, %s4674_s26 }
  0x1f   : > { %s442_s30 = ssub.s32 %s4678_s27, %s4816_s4  ;;  %p455_p5 = scmp.ne.s32.totalorder %s4674_s26, %s4670_s3 }
  0x20   : > { %p443_p6 = scmp.eq.s32.totalorder %s442_s30, 0  ;;  %p456_p7 = scmp.eq.s32.totalorder %s3830_s13, 1 }
  0x21   : > { %p461_p8 = scmp.ne.s32.totalorder %s4670_s3, %s4666_s25  ;;  %p462_p9 = scmp.eq.s32.totalorder %s3831_s28, 1 }
  0x22   : > { %s4826_s0 = scalar_select %p443_p6, %s4674_s26, %s445_s29  }
  0x23   : > { %p4828_p10 = por %p456_p7, %p455_p5  ;;  %p4832_p11 = por %p462_p9, %p461_p8 }
  0x24   : > { %5547 = sst [smem:[#allocation12_spill]] %s4826_s0  ;;  %p3833_p12 = scmp.ge.s32.totalorder %s4678_s27, 1 }
  0x25   : > { %s5549_s1 = scalar_select %p4832_p11, 1, 0 }
  0x26   : > { %p537_p13 = scmp.lt.s32.totalorder %s4678_s27, 3 }
  0x27   : > { %5550 = sst [smem:[#allocation13_spill]] %s5549_s1 }
  0x28   : > { %p538_p0 = pnand %p3833_p12, %p537_p13 }
  0x29   : > { %s5551_s24 = sld [smem:[#allocation15_spill]] (!%p538_p0)  ;;  %v588_v3 = vlaneseq (!%p538_p0)  ;;  %v4681_v4 = vmov (!%p538_p0), 0.0|0.0   ;;  %vm4682_vm0 = vmmov (!%p538_p0), 0   ;;  %v4683_v7 = vmov (!%p538_p0), 0.0   ;;  %s4853_s22 = sshll.u32 (!%p538_p0), %s3830_s13, 7 }
  0x2a   : > { %541 = sbr.rel (%p538_p0) target bundleno = 6094 (0x17ce), region = 96  ;;  %4379 = vmatprep.subr.bf16.mxu0 (!%p538_p0), %v4681_v4  ;;  %4105 = vmatprep.mubr.msk.f32.mxu0 (!%p538_p0), %vm4682_vm0, %v4683_v7  ;;  %s593_s23 = sld [smem:[#allocation3 + %s4853_s22]] (!%p538_p0) }
  0x2b   : > { %4403 = vmatprep.subr.bf16.mxu1 (!%p538_p0), %v4681_v4  ;;  %4116 = vmatprep.mubr.msk.f32.mxu1 (!%p538_p0), %vm4682_vm0, %v4683_v7  ;;  %v4859_v9 = vshrl.u32 (!%p538_p0), %v588_v3, 7  ;;  %s599_s26 = sadd.s32 (!%p538_p0), 1, %s4853_s22  ;;  %s606_s0 = sadd.s32 (!%p538_p0), 2, %s4853_s22  ;;  %v4870_v12 = vand.u32 (!%p538_p0), 127, %v588_v3 }
  0x2c   : > { %s600_s30 = sld [smem:[#allocation3 + %s599_s26]] (!%p538_p0)  ;;  %s613_s1 = sadd.s32 (!%p538_p0), 3, %s4853_s22 }
  0x2d   : > { %s4872_s4 = sld [smem:[#allocation3 + %s606_s0]] (!%p538_p0)  ;;  %s620_s27 = sadd.s32 (!%p538_p0), 4, %s4853_s22  ;;  %vm594_vm1 = vcmp.eq.s32.totalorder (!%p538_p0), %v4859_v9, 0  ;;  %vm601_vm3 = vcmp.eq.s32.totalorder (!%p538_p0), %v4859_v9, 1  ;;  %vm608_vm5 = vcmp.eq.s32.totalorder (!%p538_p0), %v4859_v9, 2  ;;  %vm615_vm10 = vcmp.eq.s32.totalorder (!%p538_p0), %v4859_v9, 3 }
  0x2e   : > { %s4875_s25 = sld [smem:[#allocation3 + %s613_s1]] (!%p538_p0)  ;;  %s627_s2 = sadd.s32 (!%p538_p0), 5, %s4853_s22  ;;  %vm622_vm13 = vcmp.eq.s32.totalorder (!%p538_p0), %v4859_v9, 4 }
  0x2f   : > { %v648_v0 = vld [vmem:[%s5551_s24] sm:$0xff] (!%p538_p0)  ;;  %v649_v1 = vld [vmem:[%s5551_s24 + $0x8] sm:$0xff] (!%p538_p0)  ;;  %v650_v2 = vld [vmem:[%s5551_s24 + $0x10] sm:$0xff] (!%p538_p0)  ;;  %s4879_s13 = sld [smem:[#allocation3 + %s620_s27]] (!%p538_p0)  ;;  %s634_s20 = sadd.s32 (!%p538_p0), 6, %s4853_s22 }
  0x30   : > { %v4380_v5 = vpack.c.bf16 (!%p538_p0), %v649_v1, %v648_v0  ;;  %v651_v6 = vld [vmem:[%s5551_s24 + $0x18] sm:$0xff] (!%p538_p0)  ;;  %v652_v10 = vld [vmem:[%s5551_s24 + $0x20] sm:$0xff] (!%p538_p0)  ;;  %v653_v11 = vld [vmem:[%s5551_s24 + $0x28] sm:$0xff] (!%p538_p0)  ;;  %v595_v16 = vstv (!%p538_p0), %s593_s23  ;;  %s4889_s1 = sld [smem:[#allocation3 + %s627_s2]] (!%p538_p0)  ;;  %s641_s23 = sadd.s32 (!%p538_p0), 7, %s4853_s22 }
  0x31   : > { %v4383_v8 = vpack.c.bf16 %v651_v6, %v650_v2  ;;  %v4386_v13 = vpack.c.bf16 %v653_v11, %v652_v10  ;;  %v654_v14 = vld [vmem:[%s5551_s24 + $0x30] sm:$0xff]  ;;  %v655_v15 = vld [vmem:[%s5551_s24 + $0x38] sm:$0xff]  ;;  %vm596_vm2 = vcmp.eq.s32.totalorder %v4870_v12, %v595_v16  ;;  %s4898_s27 = sld [smem:[#allocation3 + %s634_s20]]  ;;  %v656_v21 = vld [vmem:[%s5551_s24 + $0x40] sm:$0xff] }
  0x32   : > { %4381 = vmatpush3.bf16.msra.mxu0 %v4380_v5  ;;  %vm597_vm4 = vmand %vm594_vm1, %vm596_vm2  ;;  %v602_v17 = vstv %s600_s30  ;;  %v4389_v18 = vpack.c.bf16 %v655_v15, %v654_v14  ;;  %v657_v22 = vld [vmem:[%s5551_s24 + $0x48] sm:$0xff]  ;;  %s4915_s20 = sld [smem:[#allocation3 + %s641_s23]]  ;;  %v658_v27 = vld [vmem:[%s5551_s24 + $0x50] sm:$0xff]  ;;  %vm629_vm1 = vcmp.eq.s32.totalorder %v4859_v9, 5 }
  0x33   : > { %4382 = vmatprep.subr.bf16.mxu0 %v4681_v4  ;;  %v598_v19 = vsel %vm597_vm4, 1.0, %v4683_v7  ;;  %vm603_vm6 = vcmp.eq.s32.totalorder %v4870_v12, %v602_v17  ;;  %v609_v20 = vstv %s4872_s4  ;;  %v4392_v26 = vpack.c.bf16 %v657_v22, %v656_v21  ;;  %v659_v28 = vld [vmem:[%s5551_s24 + $0x58] sm:$0xff]  ;;  %v660_v34 = vld [vmem:[%s5551_s24 + $0x60] sm:$0xff]  ;;  %v661_v35 = vld [vmem:[%s5551_s24 + $0x68] sm:$0xff]  ;;  %s5554_s0 = sld [smem:[#allocation16_spill]]  ;;  %s5558_s5 = sld [smem:[#allocation19_spill]] }
  0x34   : > { %vm604_vm7 = vmand %vm601_vm3, %vm603_vm6  ;;  %vm610_vm8 = vcmp.eq.s32.totalorder %v4870_v12, %v609_v20  ;;  %v616_v23 = vstv %s4875_s25  ;;  %v4395_v31 = vpack.c.bf16 %v659_v28, %v658_v27  ;;  %vm636_vm4 = vcmp.eq.s32.totalorder %v4859_v9, 6  ;;  %v662_v40 = vld [vmem:[%s5551_s24 + $0x70] sm:$0xff]  ;;  %v663_v41 = vld [vmem:[%s5551_s24 + $0x78] sm:$0xff]  ;;  %s5556_s25 = sld [smem:[#allocation18_spill]]  ;;  %s5561_s6 = sld [smem:[#allocation20_spill]] }
  0x35   : > { %v605_v24 = vsel %vm604_vm7, 1.0, %v598_v19  ;;  %vm611_vm9 = vmand %vm608_vm5, %vm610_vm8  ;;  %vm617_vm11 = vcmp.eq.s32.totalorder %v4870_v12, %v616_v23  ;;  %v623_v25 = vstv %s4879_s13  ;;  %v4398_v39 = vpack.c.bf16 %v661_v35, %v660_v34  ;;  %s5555_s13 = sld [smem:[#allocation17_spill]]  ;;  %v3836_v2 = vld [vmem:[%s5508_s8] ss:$0 sm:$0xff]  ;;  %s5562_s7 = sld [smem:[#allocation21_spill]] }
  0x36   : > { %4384 = vmatpush3.bf16.msra.mxu0 %v4383_v8  ;;  %v612_v29 = vsel %vm611_vm9, 1.0, %v605_v24  ;;  %vm618_vm12 = vmand %vm615_vm10, %vm617_vm11  ;;  %vm624_vm14 = vcmp.eq.s32.totalorder %v4870_v12, %v623_v25  ;;  %v630_v30 = vstv %s4889_s1  ;;  %vm643_vm7 = vcmp.eq.s32.totalorder %v4859_v9, 7  ;;  %v3837_v8 = vld [vmem:[%s5509_s9] ss:$0 sm:$0xff]  ;;  %s5563_s28 = sld [smem:[#allocation22_spill]] }
  0x37   : > { %4385 = vmatprep.subr.bf16.mxu0 %v4681_v4  ;;  %v619_v32 = vsel %vm618_vm12, 1.0, %v612_v29  ;;  %vm625_vm15 = vmand %vm622_vm13, %vm624_vm14  ;;  %vm631_vm2 = vcmp.eq.s32.totalorder %v4870_v12, %v630_v30  ;;  %v637_v33 = vstv %s4898_s27  ;;  %v4401_v43 = vpack.c.bf16 %v663_v41, %v662_v40  ;;  %s5564_s27 = sld [smem:[#allocation23_spill]] }
  0x38   : > { %v626_v36 = vsel %vm625_vm15, 1.0, %v619_v32  ;;  %vm4937_vm3 = vmand %vm629_vm1, %vm631_vm2  ;;  %vm638_vm5 = vcmp.eq.s32.totalorder %v4870_v12, %v637_v33  ;;  %v644_v38 = vstv %s4915_s20  ;;  %vm738_vm10 = vcmask 261120   ;;  %s585_s20 = sand.u32 1, %s4670_s3  }
  0x39   : > { %v633_v42 = vsel %vm4937_vm3, 1.0, %v626_v36  ;;  %vm639_vm6 = vmand %vm636_vm4, %vm638_vm5  ;;  %vm645_vm8 = vcmp.eq.s32.totalorder %v4870_v12, %v644_v38  ;;  %v664_v46 = vld [vmem:[%s5554_s0] sm:$0xff]  ;;  %v920_v20 = vld [vmem:[%s5558_s5 + $0x10] sm:$0xff]  ;;  %vm1120_vm11 = vcmask 64512   ;;  %vm5043_vm12 = vcmp.ge.s32.totalorder %v4859_v9, %v4870_v12  ;;  %s3834_s4 = sshll.u32 %s585_s20, 3 }
  0x3a   : > { %4387 = vmatpush3.bf16.msra.mxu0 %v4386_v13  ;;  %v640_v44 = vsel %vm639_vm6, 1.0, %v633_v42  ;;  %vm646_vm9 = vmand %vm643_vm7, %vm645_vm8  ;;  %s5557_s29 = smov %s5556_s25  ;;  %v844_v5 = vld [vmem:[%s5556_s25] sm:$0xff]  ;;  %v921_v21 = vld [vmem:[%s5558_s5 + $0x18] sm:$0xff]  ;;  %s587_s23 = scalar_lea.vmem [#allocation4], %s3834_s4 }
  0x3b   : > { %4388 = vmatprep.subr.bf16.mxu0 %v4681_v4  ;;  %v647_v45 = vsel %vm646_vm9, 1.0, %v640_v44  ;;  %v767_v56 = vld [vmem:[%s5555_s13] sm:$0xff]  ;;  %v768_v57 = vld [vmem:[%s5555_s13 + $0x8] sm:$0xff]  ;;  %v769_v58 = vld [vmem:[%s5555_s13 + $0x10] sm:$0xff]  ;;  %v4419_v22 = vpack.c.bf16 %v921_v21, %v920_v20  ;;  %s3784_s2 = sshll.u32 %s587_s23, 4  ;;  %s4684_s4 = smov [#allocation4]   ;;  %s5460_s2 = int_to_ptr.vmem [resolvable:$true] %s3784_s2 }
  0x3c   : > { %v4404_v59 = vpack.c.bf16 %v768_v57, %v767_v56  ;;  %v770_v60 = vld [vmem:[%s5555_s13 + $0x18] sm:$0xff]  ;;  %v845_v6 = vld [vmem:[%s5557_s29 + $0x8] sm:$0xff]  ;;  %v846_v14 = vld [vmem:[%s5557_s29 + $0x10] sm:$0xff]  ;;  %s4618_s0 = sshll.u32 %s4684_s4, 4  ;;  %s4619_s0 = int_to_ptr.vmem [resolvable:$false] %s4618_s0 }
  0x3d   : > { %v4407_v61 = vpack.c.bf16 %v770_v60, %v769_v58  ;;  %v4410_v11 = vpack.c.bf16 %v845_v6, %v844_v5  ;;  %v847_v15 = vld [vmem:[%s5557_s29 + $0x18] sm:$0xff]  ;;  %v918_v17 = vld [vmem:[%s5558_s5] sm:$0xff]  ;;  %s5565_s30 = smov %s5564_s27  ;;  %s4620_s25 = scalar_lea.vmem %s4619_s0, 256 }
  0x3e   : > { %4390 = vmatpush3.bf16.msra.mxu0 %v4389_v18  ;;  %4405 = vmatpush3.bf16.msra.mxu1 %v4404_v59  ;;  %v4413_v16 = vpack.c.bf16 %v847_v15, %v846_v14  ;;  %v919_v18 = vld [vmem:[%s5558_s5 + $0x8] sm:$0xff]  ;;  %p4621_p4 = scmp.lt.s32.totalorder %s5460_s2, %s4619_s0 }
  0x3f   : > { %4391 = vmatprep.subr.bf16.mxu0 %v4681_v4  ;;  %4406 = vmatprep.subr.bf16.mxu1 %v4681_v4  ;;  %v4416_v19 = vpack.c.bf16 %v919_v18, %v918_v17 }
  0x42   : > { %4393 = vmatpush3.bf16.msra.mxu0 %v4392_v26  ;;  %4408 = vmatpush3.bf16.msra.mxu1 %v4407_v61 }
  0x43   : > { %4394 = vmatprep.subr.bf16.mxu0 %v4681_v4  ;;  %4409 = vmatprep.subr.bf16.mxu1 %v4681_v4 }
  0x46   : > { %4396 = vmatpush3.bf16.msra.mxu0 %v4395_v31 }
  0x47   : > { %4397 = vmatprep.subr.bf16.mxu0 %v4681_v4 }
  0x4a   : > { %4399 = vmatpush3.bf16.msra.mxu0 %v4398_v39 }
  0x4b   : > { %4400 = vmatprep.subr.bf16.mxu0 %v4681_v4 }
  0x4e   : > { %4402 = vmatpush3.bf16.msra.mxu0 %v4401_v43 }
  0x4f   : > { %4161 = vmatprep.subr.mxu0 %v4683_v7 }
  0x51   : > { %4106 = vmatmul.mubr.f32.vlgmr.msra.gmra.mrb[0].mxu0 %v647_v45 }
  0x52   : > { %4163 = vmatprep.mubr.msk.f32.mxu0 %vm4682_vm0, %v4683_v7 }
 0x124   : > { %v731_v47 = vpop.f32.mrb[0].mxu0 }
 0x125   : > { %v4962_v48 = vadd.f32 %v731_v47, %v664_v46  ;;  %v4107_v49 = vpop.f32.mrb[1].mxu0 }
 0x127   : > { %v739_v50 = vsel %vm738_vm10, %v4962_v48, 0.0 }
 0x128   : > { %740 = vadd.xlane.f32.xlu0 %v739_v50 }
 0x1b5   : > { %v741_v51 = vpop.xlane.xlu0 %740 }
 0x1b6   : > { %v743_v52 = vmul.f32 0.03125, %v741_v51 }
 0x1b8   : > { %v744_v53 = vsub.f32 %v4962_v48, %v743_v52 }
 0x1ba   : > { %v745_v54 = vmul.f32 %v744_v53, %v744_v53 }
 0x1bc   : > { %v746_v55 = vsel %vm738_vm10, %v745_v54, 0.0 }
 0x1bd   : > { %747 = vadd.xlane.f32.xlu0 %v746_v55 }
 0x24a   : > { %v748_v62 = vpop.xlane.xlu0 %747 }
 0x24b   : > { %v749_v63 = vmul.f32 0.03125, %v748_v62 }
 0x24d   : > { %v750_v0 = vadd.f32 1e-05, %v749_v63 }
 0x24f   : > { %4560 = vrsqrt.f32 %v750_v0 }
 0x259   : > { %v4561_v1 = vpop.eup %4560 }
 0x25a   : > { %v752_v3 = vmul.f32 %v4561_v1, %v744_v53 }
 0x25c   : > { %v759_v10 = vmul.f32 %v3836_v2, %v752_v3 }
 0x25e   : > { %v766_v13 = vadd.f32 %v3837_v8, %v759_v10 }
 0x260   : > { %4117 = vmatmul.mubr.msk.f32.vlgmr.msra.gmra.mrb[0].mxu1 %vm738_vm10, %v766_v13 }
 0x261   : > { %4411 = vmatpush3.bf16.msra.mxu1 %v4410_v11  ;;  %4127 = vmatprep.mubr.msk.f32.mxu1 %vm4682_vm0, %v4683_v7 }
 0x262   : > { %4412 = vmatprep.subr.bf16.mxu1 %v4681_v4 }
 0x265   : > { %4414 = vmatpush3.bf16.msra.mxu1 %v4413_v16 }
 0x266   : > { %4415 = vmatprep.subr.bf16.mxu1 %v4681_v4 }
 0x268   : > { %4128 = vmatmul.mubr.msk.f32.vlgmr.msra.gmra.mrb[2].mxu1 %vm738_vm10, %v766_v13 }
 0x269   : > { %4417 = vmatpush3.bf16.msra.mxu1 %v4416_v19  ;;  %4138 = vmatprep.mubr.msk.f32.mxu1 %vm4682_vm0, %v4683_v7 }
 0x26a   : > { %4418 = vmatprep.subr.bf16.mxu1 %v4681_v4 }
 0x26d   : > { %4420 = vmatpush3.bf16.msra.mxu1 %v4419_v22 }
 0x26e   : > { %4141 = vmatprep.subr.mxu1 %v4683_v7 }
 0x270   : > { %4139 = vmatmul.mubr.msk.f32.vlgmr.msra.gmra.mrb[4].mxu1 %vm738_vm10, %v766_v13 }
 0x271   : > { %4143 = vmatprep.mubr.msk.f32.mxu1 %vm4682_vm0, %v4683_v7 }
 0x333   : > { %v840_v23 = vpop.f32.mrb[0].mxu1 }
 0x334   : > { %992 = vxpose.xlu1.b32.start.end [1/1] (short) (narrow) %v840_v23, 32  ;;  %v4118_v24 = vpop.f32.mrb[1].mxu1 }
 0x33b   : > { %v914_v25 = vpop.f32.mrb[2].mxu1 }
 0x33c   : > { %v4129_v26 = vpop.f32.mrb[3].mxu1 }
 0x341   : > { %1024 = vxpose.xlu1.b32.start.end [1/1] (short) (narrow) %v914_v25, 32 }
 0x343   : > { %v988_v27 = vpop.f32.mrb[4].mxu1 }
 0x344   : > { %v4140_v28 = vpop.f32.mrb[5].mxu1 }
 0x3b4   : > { %v1008_v29 = vpop.trf.xlu1 }
 0x3b5   : > { %1088 = vxpose.xlu0.b32.start.end [1/1] (short) (narrow) %v1008_v29, 8 }
 0x3b8   : > { %v1009_v30 = vpop.trf.xlu1 }
 0x3b9   : > { %1194 = vxpose.xlu1.b32.start.end [1/1] (short) (narrow) %v1009_v30, 8 }
 0x3bc   : > { %v1010_v31 = vpop.trf.xlu1 }
 0x3bd   : > { %1299 = vxpose.xlu1.b32.start.end [1/1] (short) (narrow) %v1010_v31, 8 }
 0x3c0   : > { %v1011_v32 = vpop.trf.xlu1 }
 0x3c1   : > { %1404 = vxpose.xlu1.b32.start.end [1/1] (short) (narrow) %v1011_v32, 8 }
 0x3c4   : > { %v1040_v33 = vpop.trf.xlu1 }
 0x3c5   : > { %4142 = vmatpush3.msra.mxu1 %v1040_v33 }
 0x3c6   : > { %4146 = vmatprep.subr.mxu1 %v4683_v7 }
 0x3c8   : > { %v1041_v34 = vpop.trf.xlu1 }
 0x3cc   : > { %v1042_v35 = vpop.trf.xlu1 }
 0x3d0   : > { %v1043_v36 = vpop.trf.xlu1 }
 0x435   : > { %v1104_v37 = vpop.trf.xlu0 }
 0x436   : > { %4144 = vmatmul.mubr.msk.f32.vlgmr.msra.gmra.mrb[6].mxu1 %vm1120_vm11, %v1104_v37  ;;  %v1899_v37 = vld [vmem:[%s5561_s6] sm:$0xff] }
 0x437   : > { %4147 = vmatpush3.msra.mxu1 %v1041_v34  ;;  %4148 = vmatprep.mubr.msk.f32.mxu1 %vm4682_vm0, %v4683_v7 }
 0x438   : > { %4151 = vmatprep.subr.mxu1 %v4683_v7 }
 0x439   : > { %v1210_v38 = vpop.trf.xlu1 }
 0x43a   : > { %4149 = vmatmul.mubr.msk.f32.vlgmr.msra.gmra.mrb[8].mxu1 %vm1120_vm11, %v1210_v38  ;;  %v1900_v38 = vld [vmem:[%s5561_s6 + $0x8] sm:$0xff] }
 0x43b   : > { %4152 = vmatpush3.msra.mxu1 %v1042_v35  ;;  %4153 = vmatprep.mubr.msk.f32.mxu1 %vm4682_vm0, %v4683_v7 }
 0x43c   : > { %4156 = vmatprep.subr.mxu1 %v4683_v7 }
 0x43d   : > { %v1315_v39 = vpop.trf.xlu1 }
 0x43e   : > { %4154 = vmatmul.mubr.msk.f32.vlgmr.msra.gmra.mrb[10].mxu1 %vm1120_vm11, %v1315_v39  ;;  %v1901_v39 = vld [vmem:[%s5561_s6 + $0x10] sm:$0xff] }
 0x43f   : > { %4157 = vmatpush3.msra.mxu1 %v1043_v36  ;;  %4158 = vmatprep.mubr.msk.f32.mxu1 %vm4682_vm0, %v4683_v7 }
 0x440   : > { %4166 = vmatprep.subr.mxu1 %v4683_v7 }
 0x441   : > { %v1420_v40 = vpop.trf.xlu1 }
 0x442   : > { %4159 = vmatmul.mubr.msk.f32.vlgmr.msra.gmra.mrb[12].mxu1 %vm1120_vm11, %v1420_v40  ;;  %v4422_v40 = vpack.c.bf16 %v1900_v38, %v1899_v37  ;;  %v2112_v38 = vld [vmem:[%s5514_s14 + $0x70] sm:$0xff] }
 0x443   : > { %4168 = vmatprep.mubr.msk.f32.mxu1 %vm4682_vm0, %v4683_v7 }
 0x509   : > { %v1190_v41 = vpop.f32.mrb[6].mxu1 }
 0x50a   : > { %v1509_v43 = vmul.f32 0.35355338, %v1190_v41  ;;  %v4145_v44 = vpop.f32.mrb[7].mxu1  ;;  %v1902_v41 = vld [vmem:[%s5561_s6 + $0x18] sm:$0xff] }
 0x50c   : > { %v1515_v45 = vsel %vm5043_vm12, %v1509_v43, -1e+30  ;;  %v4425_v43 = vpack.c.bf16 %v1902_v41, %v1901_v39  ;;  %v2113_v39 = vld [vmem:[%s5514_s14 + $0x78] sm:$0xff]  ;;  %v3857_v41 = vld [vmem:[%s5563_s28] ss:$0 sm:$0xff] }
 0x50d   : > { %v1295_v46 = vpop.f32.mrb[8].mxu1  ;;  %v1519_v47 = vsel %vm1120_vm11, %v1515_v45, -inf }
 0x50e   : > { %v1510_v49 = vmul.f32 0.35355338, %v1295_v46  ;;  %1520 = vmax.xlane.f32.xlu1 %v1519_v47  ;;  %v4150_v50 = vpop.f32.mrb[9].mxu1 }
 0x510   : > { %v1516_v51 = vsel %vm5043_vm12, %v1510_v49, -1e+30 }
 0x511   : > { %v1400_v52 = vpop.f32.mrb[10].mxu1  ;;  %v1522_v9 = vsel %vm1120_vm11, %v1516_v51, -inf }
 0x512   : > { %v1511_v12 = vmul.f32 0.35355338, %v1400_v52  ;;  %1523 = vmax.xlane.f32.xlu0 %v1522_v9  ;;  %v4155_v53 = vpop.f32.mrb[11].mxu1 }
 0x514   : > { %v1517_v54 = vsel %vm5043_vm12, %v1511_v12, -1e+30  ;;  %v3853_v12 = vld [vmem:[%s5562_s7] ss:$0 sm:$0xff] }
 0x515   : > { %v1505_v55 = vpop.f32.mrb[12].mxu1  ;;  %v1525_v56 = vsel %vm1120_vm11, %v1517_v54, -inf }
 0x516   : > { %v1512_v57 = vmul.f32 0.35355338, %v1505_v55  ;;  %1526 = vmax.xlane.f32.xlu1 %v1525_v56  ;;  %v4160_v58 = vpop.f32.mrb[13].mxu1 }
 0x518   : > { %v1518_v59 = vsel %vm5043_vm12, %v1512_v57, -1e+30 }
 0x519   : > { %v1528_v60 = vsel %vm1120_vm11, %v1518_v59, -inf }
 0x51a   : > { %1529 = vmax.xlane.f32.xlu1 %v1528_v60 }
 0x53f   : > { %1056 = vxpose.xlu0.b32.start.end [1/1] (short) (narrow) %v988_v27, 32 }
 0x59b   : > { %v1521_v61 = vpop.xlane.xlu1 %1520 }
 0x59c   : > { %v1531_v62 = vsub.f32 %v1515_v45, %v1521_v61 }
 0x59e   : > { %v1535_v63 = vmul.f32 1.442695, %v1531_v62 }
 0x59f   : > { %v1524_v0 = vpop.xlane.xlu0 %1523 }
 0x5a0   : > { %4562 = vpow2.f32 %v1535_v63  ;;  %v1532_v1 = vsub.f32 %v1516_v51, %v1524_v0  ;;  %v2013_v63 = vld [vmem:[%s5512_s12] sm:$0xff] }
 0x5a2   : > { %v1537_v2 = vmul.f32 1.442695, %v1532_v1  ;;  %v2015_v1 = vld [vmem:[%s5512_s12 + $0x10] sm:$0xff] }
 0x5a3   : > { %v1527_v3 = vpop.xlane.xlu1 %1526 }
 0x5a4   : > { %4564 = vpow2.f32 %v1537_v2  ;;  %v1533_v5 = vsub.f32 %v1517_v54, %v1527_v3  ;;  %v2016_v2 = vld [vmem:[%s5512_s12 + $0x18] sm:$0xff] }
 0x5a5   : > { %v4431_v3 = vpack.c.bf16 %v2016_v2, %v2015_v1  ;;  %v3862_v2 = vld [vmem:[%s5508_s8 + $0x1] ss:$0 sm:$0xff] }
 0x5a6   : > { %v1539_v6 = vmul.f32 1.442695, %v1533_v5  ;;  %v2098_v5 = vld [vmem:[%s5514_s14] sm:$0xff] }
 0x5a7   : > { %v1530_v8 = vpop.xlane.xlu1 %1529 }
 0x5a8   : > { %4566 = vpow2.f32 %v1539_v6  ;;  %v1534_v10 = vsub.f32 %v1518_v59, %v1530_v8  ;;  %v2099_v6 = vld [vmem:[%s5514_s14 + $0x8] sm:$0xff]  ;;  %v2100_v8 = vld [vmem:[%s5514_s14 + $0x10] sm:$0xff] }
 0x5aa   : > { %v4563_v11 = vpop.eup %4562  ;;  %v1541_v13 = vmul.f32 1.442695, %v1534_v10  ;;  %v4434_v10 = vpack.c.bf16 %v2099_v6, %v2098_v5  ;;  %v3869_v5 = vld [vmem:[%s5557_s29 + $0x20] sm:$0xff]  ;;  %v3870_v6 = vld [vmem:[%s5557_s29 + $0x28] sm:$0xff] }
 0x5ab   : > { %v1543_v14 = vsel %vm1120_vm11, %v4563_v11, 0.0 }
 0x5ac   : > { %4568 = vpow2.f32 %v1541_v13  ;;  %1544 = vadd.xlane.f32.xlu1 %v1543_v14  ;;  %v2102_v14 = vld [vmem:[%s5514_s14 + $0x20] sm:$0xff] }
 0x5ae   : > { %v4565_v15 = vpop.eup %4564 }
 0x5af   : > { %v1546_v16 = vsel %vm1120_vm11, %v4565_v15, 0.0 }
 0x5b0   : > { %1547 = vadd.xlane.f32.xlu1 %v1546_v16 }
 0x5b2   : > { %v4567_v17 = vpop.eup %4566 }
 0x5b3   : > { %v1549_v18 = vsel %vm1120_vm11, %v4567_v17, 0.0 }
 0x5b4   : > { %1550 = vadd.xlane.f32.xlu1 %v1549_v18  ;;  %v2105_v18 = vld [vmem:[%s5514_s14 + $0x38] sm:$0xff] }
 0x5b6   : > { %v4569_v19 = vpop.eup %4568 }
 0x5b7   : > { %v1552_v20 = vsel %vm1120_vm11, %v4569_v19, 0.0 }
 0x5b8   : > { %1553 = vadd.xlane.f32.xlu1 %v1552_v20  ;;  %v2106_v20 = vld [vmem:[%s5514_s14 + $0x40] sm:$0xff] }
 0x5bf   : > { %v1072_v24 = vpop.trf.xlu0 }
 0x5c3   : > { %v1073_v28 = vpop.trf.xlu0 }
 0x5c7   : > { %v1074_v33 = vpop.trf.xlu0 }
 0x5cb   : > { %v1075_v36 = vpop.trf.xlu0 }
 0x639   : > { %v1545_v21 = vpop.xlane.xlu1 %1544 }
 0x63a   : > { %4570 = vrcp.f32 %v1545_v21  ;;  %v2107_v21 = vld [vmem:[%s5514_s14 + $0x48] sm:$0xff] }
 0x63d   : > { %v1548_v22 = vpop.xlane.xlu1 %1547 }
 0x63e   : > { %4572 = vrcp.f32 %v1548_v22  ;;  %v4446_v22 = vpack.c.bf16 %v2107_v21, %v2106_v20  ;;  %v3876_v20 = vld [vmem:[%s5558_s5 + $0x30] sm:$0xff]  ;;  %v3877_v21 = vld [vmem:[%s5558_s5 + $0x38] sm:$0xff] }
 0x641   : > { %v1551_v23 = vpop.xlane.xlu1 %1550 }
 0x642   : > { %4574 = vrcp.f32 %v1551_v23  ;;  %v2108_v23 = vld [vmem:[%s5514_s14 + $0x50] sm:$0xff] }
 0x644   : > { %v4571_v25 = vpop.eup %4570 }
 0x645   : > { %v1556_v26 = vmul.f32 %v4571_v25, %v4563_v11  ;;  %v1554_v27 = vpop.xlane.xlu1 %1553  ;;  %v2101_v11 = vld [vmem:[%s5514_s14 + $0x18] sm:$0xff] }
 0x646   : > { %4576 = vrcp.f32 %v1554_v27  ;;  %v4437_v13 = vpack.c.bf16 %v2101_v11, %v2100_v8  ;;  %v2111_v27 = vld [vmem:[%s5514_s14 + $0x68] sm:$0xff]  ;;  %v3863_v8 = vld [vmem:[%s5509_s9 + $0x1] ss:$0 sm:$0xff]  ;;  %v4464_v11 = vpack.c.bf16 %v3870_v6, %v3869_v5 }
 0x647   : > { %4162 = vmatpush3.xpose.msk.msra.mxu0 %vm1120_vm11, %v1556_v26  ;;  %v2110_v26 = vld [vmem:[%s5514_s14 + $0x60] sm:$0xff] }
 0x648   : > { %v4573_v29 = vpop.eup %4572  ;;  %4171 = vmatprep.subr.mxu0 %v4683_v7 }
 0x649   : > { %v1558_v30 = vmul.f32 %v4573_v29, %v4565_v15  ;;  %v2103_v15 = vld [vmem:[%s5514_s14 + $0x28] sm:$0xff] }
 0x64a   : > { %4164 = vmatmul.mubr.msk.f32.vlgmr.msra.gmra.mrb[2].mxu0 %vm1120_vm11, %v1072_v24  ;;  %v4440_v16 = vpack.c.bf16 %v2103_v15, %v2102_v14  ;;  %v2109_v24 = vld [vmem:[%s5514_s14 + $0x58] sm:$0xff]  ;;  %v3871_v14 = vld [vmem:[%s5557_s29 + $0x30] sm:$0xff] }
 0x64b   : > { %4167 = vmatpush3.xpose.msk.msra.mxu1 %vm1120_vm11, %v1558_v30  ;;  %4173 = vmatprep.mubr.msk.f32.mxu0 %vm4682_vm0, %v4683_v7  ;;  %v4449_v25 = vpack.c.bf16 %v2109_v24, %v2108_v23  ;;  %v3872_v15 = vld [vmem:[%s5557_s29 + $0x38] sm:$0xff] }
 0x64c   : > { %v4575_v31 = vpop.eup %4574  ;;  %4176 = vmatprep.subr.mxu1 %v4683_v7 }
 0x64d   : > { %v1560_v32 = vmul.f32 %v4575_v31, %v4567_v17  ;;  %v2104_v17 = vld [vmem:[%s5514_s14 + $0x30] sm:$0xff] }
 0x64e   : > { %4169 = vmatmul.mubr.msk.f32.vlgmr.msra.gmra.mrb[14].mxu1 %vm1120_vm11, %v1073_v28  ;;  %v4452_v28 = vpack.c.bf16 %v2111_v27, %v2110_v26 }
 0x64f   : > { %4172 = vmatpush3.xpose.msk.msra.mxu0 %vm1120_vm11, %v1560_v32  ;;  %4178 = vmatprep.mubr.msk.f32.mxu1 %vm4682_vm0, %v4683_v7 }
 0x650   : > { %v4577_v34 = vpop.eup %4576  ;;  %4433 = vmatprep.subr.bf16.mxu0 %v4681_v4 }
 0x651   : > { %v1562_v35 = vmul.f32 %v4577_v34, %v4569_v19  ;;  %v4443_v19 = vpack.c.bf16 %v2105_v18, %v2104_v17  ;;  %v3874_v17 = vld [vmem:[%s5558_s5 + $0x20] sm:$0xff]  ;;  %v3875_v18 = vld [vmem:[%s5558_s5 + $0x28] sm:$0xff]  ;;  %s5458_s5 = scalar_lea.hbm %s5564_s27, %s4853_s22 }
 0x652   : > { %4174 = vmatmul.mubr.msk.f32.vlgmr.msra.gmra.mrb[4].mxu0 %vm1120_vm11, %v1074_v33  ;;  %v3855_v33 = vld [vmem:[%s5510_s10] ss:$0 sm:$0xff] }
 0x653   : > { %4177 = vmatpush3.xpose.msk.msra.mxu1 %vm1120_vm11, %v1562_v35  ;;  %4235 = vmatprep.mubr.msk.f32.mxu0 %vm4682_vm0, %v4683_v7  ;;  %v3856_v35 = vld [vmem:[%s5511_s11] ss:$0 sm:$0xff] }
 0x654   : > { %4421 = vmatprep.subr.bf16.mxu1 %v4681_v4  ;;  %4435 = vmatpush3.bf16.msra.mxu0 %v4434_v10 }
 0x655   : > { %4436 = vmatprep.subr.bf16.mxu0 %v4681_v4 }
 0x656   : > { %4179 = vmatmul.mubr.msk.f32.vlgmr.msra.gmra.mrb[16].mxu1 %vm1120_vm11, %v1075_v36 }
 0x657   : > { %4189 = vmatprep.mubr.msk.f32.mxu1 %vm4682_vm0, %v4683_v7  ;;  %4423 = vmatpush3.bf16.msra.mxu1 %v4422_v40  ;;  %v4455_v40 = vpack.c.bf16 %v2113_v39, %v2112_v38 }
 0x658   : > { %4424 = vmatprep.subr.bf16.mxu1 %v4681_v4  ;;  %4438 = vmatpush3.bf16.msra.mxu0 %v4437_v13 }
 0x659   : > { %4439 = vmatprep.subr.bf16.mxu0 %v4681_v4 }
 0x65b   : > { %4426 = vmatpush3.bf16.msra.mxu1 %v4425_v43 }
 0x65c   : > { %4427 = vmatprep.subr.bf16.mxu1 %v4681_v4  ;;  %4441 = vmatpush3.bf16.msra.mxu0 %v4440_v16  ;;  %v4467_v16 = vpack.c.bf16 %v3872_v15, %v3871_v14 }
 0x65d   : > { %4442 = vmatprep.subr.bf16.mxu0 %v4681_v4 }
 0x660   : > { %4444 = vmatpush3.bf16.msra.mxu0 %v4443_v19  ;;  %v4470_v19 = vpack.c.bf16 %v3875_v18, %v3874_v17 }
 0x661   : > { %4445 = vmatprep.subr.bf16.mxu0 %v4681_v4 }
 0x664   : > { %4447 = vmatpush3.bf16.msra.mxu0 %v4446_v22  ;;  %v4473_v22 = vpack.c.bf16 %v3877_v21, %v3876_v20 }
 0x665   : > { %4448 = vmatprep.subr.bf16.mxu0 %v4681_v4 }
 0x668   : > { %4450 = vmatpush3.bf16.msra.mxu0 %v4449_v25 }
 0x669   : > { %4451 = vmatprep.subr.bf16.mxu0 %v4681_v4 }
 0x66c   : > { %4453 = vmatpush3.bf16.msra.mxu0 %v4452_v28 }
 0x66d   : > { %4454 = vmatprep.subr.bf16.mxu0 %v4681_v4 }
 0x670   : > { %4456 = vmatpush3.bf16.msra.mxu0 %v4455_v40 }
 0x671   : > { %4281 = vmatprep.subr.mxu0 %v4683_v7 }
 0x71d   : > { %v1635_v44 = vpop.f32.mrb[2].mxu0 }
 0x71e   : > { %1867 = vxpose.xlu1.b32.start [1/4] (short) (narrow) %v1635_v44, 8  ;;  %v4165_v45 = vpop.f32.mrb[3].mxu0 }
 0x721   : > { %v1711_v46 = vpop.f32.mrb[14].mxu1 }
 0x722   : > { %v4170_v47 = vpop.f32.mrb[15].mxu1  ;;  %1868 = vxpose.xlu1.b32.cont [2/4] (short) (narrow) %v1711_v46, 8 }
 0x723   : > { %v3859_v47 = vld [vmem:[%s5515_s15] ss:$0 sm:$0xff] }
 0x725   : > { %v1787_v49 = vpop.f32.mrb[4].mxu0 }
 0x726   : > { %1869 = vxpose.xlu1.b32.cont [3/4] (short) (narrow) %v1787_v49, 8  ;;  %v4175_v50 = vpop.f32.mrb[5].mxu0 }
 0x729   : > { %v1863_v51 = vpop.f32.mrb[16].mxu1 }
 0x72a   : > { %v4180_v52 = vpop.f32.mrb[17].mxu1  ;;  %1870 = vxpose.xlu1.b32.end [4/4] (short) (narrow) %v1863_v51, 8 }
 0x79e   : > { %v1883_v9 = vpop.trf.xlu1 }
 0x79f   : > { %4190 = vmatmul.mubr.msk.f32.vlgmr.msra.gmra.mrb[18].mxu1 %vm738_vm10, %v1883_v9 }
 0x7a0   : > { %4200 = vmatprep.mubr.msk.f32.mxu1 %vm4682_vm0, %v4683_v7 }
 0x872   : > { %v1979_v53 = vpop.f32.mrb[18].mxu1 }
 0x873   : > { %v1980_v54 = vadd.f32 %v3853_v12, %v1979_v53  ;;  %v4191_v55 = vpop.f32.mrb[19].mxu1 }
 0x875   : > { %v5104_v56 = vadd.f32 %v1980_v54, %v4962_v48  ;;  %v2014_v48 = vld [vmem:[%s5512_s12 + $0x8] sm:$0xff] }
 0x876   : > { %v4428_v0 = vpack.c.bf16 %v2014_v48, %v2013_v63 }
 0x877   : > { %v1986_v57 = vsel %vm738_vm10, %v5104_v56, 0.0 }
 0x878   : > { %1987 = vadd.xlane.f32.xlu0 %v1986_v57  ;;  %4429 = vmatpush3.bf16.msra.mxu1 %v4428_v0 }
 0x879   : > { %4430 = vmatprep.subr.bf16.mxu1 %v4681_v4 }
 0x87c   : > { %4432 = vmatpush3.bf16.msra.mxu1 %v4431_v3 }
 0x87d   : > { %4457 = vmatprep.subr.bf16.mxu1 %v4681_v4 }
 0x905   : > { %v1988_v58 = vpop.xlane.xlu0 %1987 }
 0x906   : > { %v1989_v59 = vmul.f32 0.03125, %v1988_v58  ;;  %v3864_v58 = vld [vmem:[%s5555_s13 + $0x20] sm:$0xff] }
 0x908   : > { %v1990_v60 = vsub.f32 %v5104_v56, %v1989_v59 }
 0x90a   : > { %v1991_v61 = vmul.f32 %v1990_v60, %v1990_v60 }
 0x90c   : > { %v1992_v62 = vsel %vm738_vm10, %v1991_v61, 0.0  ;;  %v3867_v61 = vld [vmem:[%s5555_s13 + $0x38] sm:$0xff] }
 0x90d   : > { %1993 = vadd.xlane.f32.xlu1 %v1992_v62 }
 0x99a   : > { %v1994_v29 = vpop.xlane.xlu1 %1993 }
 0x99b   : > { %v1995_v30 = vmul.f32 0.03125, %v1994_v29 }
 0x99d   : > { %v1996_v31 = vadd.f32 1e-05, %v1995_v30 }
 0x99f   : > { %4578 = vrsqrt.f32 %v1996_v31 }
 0x9a9   : > { %v4579_v32 = vpop.eup %4578 }
 0x9aa   : > { %v1998_v34 = vmul.f32 %v4579_v32, %v1990_v60  ;;  %v3866_v60 = vld [vmem:[%s5555_s13 + $0x30] sm:$0xff] }
 0x9ab   : > { %v4461_v62 = vpack.c.bf16 %v3867_v61, %v3866_v60 }
 0x9ac   : > { %v2005_v36 = vmul.f32 %v3855_v33, %v1998_v34 }
 0x9ae   : > { %v2012_v37 = vadd.f32 %v3856_v35, %v2005_v36 }
 0x9b0   : > { %4201 = vmatmul.mubr.msk.f32.vlgmr.msra.gmra.mrb[20].mxu1 %vm738_vm10, %v2012_v37 }
 0x9b1   : > { %4246 = vmatprep.mubr.msk.f32.mxu1 %vm4682_vm0, %v4683_v7 }
 0xa83   : > { %v2093_v43 = vpop.f32.mrb[20].mxu1 }
 0xa84   : > { %v2094_v44 = vadd.f32 %v3857_v41, %v2093_v43  ;;  %v4202_v45 = vpop.f32.mrb[21].mxu1 }
 0xa86   : > { %v2097_v46 = vmax.f32 %v2094_v44, 0.0 }
 0xa88   : > { %4236 = vmatmul.mubr.f32.vlgmr.msra.gmra.mrb[6].mxu0 %v2097_v46 }
 0xa89   : > { %4283 = vmatprep.mubr.msk.f32.mxu0 %vm4682_vm0, %v4683_v7 }
 0xb5b   : > { %v2187_v49 = vpop.f32.mrb[6].mxu0 }
 0xb5c   : > { %v2188_v50 = vadd.f32 %v3859_v47, %v2187_v49  ;;  %v4237_v51 = vpop.f32.mrb[7].mxu0 }
 0xb5e   : > { %v5198_v52 = vadd.f32 %v2188_v50, %v5104_v56  ;;  %v3865_v56 = vld [vmem:[%s5555_s13 + $0x28] sm:$0xff] }
 0xb5f   : > { %v4458_v59 = vpack.c.bf16 %v3865_v56, %v3864_v58 }
 0xb60   : > { %v2196_v9 = vsel %vm738_vm10, %v5198_v52, 0.0 }
 0xb61   : > { %2197 = vadd.xlane.f32.xlu0 %v2196_v9  ;;  %4459 = vmatpush3.bf16.msra.mxu1 %v4458_v59 }
 0xb62   : > { %4460 = vmatprep.subr.bf16.mxu1 %v4681_v4 }
 0xb65   : > { %4462 = vmatpush3.bf16.msra.mxu1 %v4461_v62 }
 0xb66   : > { %4463 = vmatprep.subr.bf16.mxu1 %v4681_v4 }
 0xbee   : > { %v2198_v12 = vpop.xlane.xlu0 %2197 }
 0xbef   : > { %v2199_v53 = vmul.f32 0.03125, %v2198_v12 }
 0xbf1   : > { %v2200_v54 = vsub.f32 %v5198_v52, %v2199_v53 }
 0xbf3   : > { %v2201_v55 = vmul.f32 %v2200_v54, %v2200_v54 }
 0xbf5   : > { %v2202_v57 = vsel %vm738_vm10, %v2201_v55, 0.0 }
 0xbf6   : > { %2203 = vadd.xlane.f32.xlu1 %v2202_v57 }
 0xc83   : > { %v2204_v63 = vpop.xlane.xlu1 %2203 }
 0xc84   : > { %v2205_v48 = vmul.f32 0.03125, %v2204_v63 }
 0xc86   : > { %v2206_v0 = vadd.f32 1e-05, %v2205_v48 }
 0xc88   : > { %4580 = vrsqrt.f32 %v2206_v0 }
 0xc92   : > { %v4581_v1 = vpop.eup %4580 }
 0xc93   : > { %v2208_v3 = vmul.f32 %v4581_v1, %v2200_v54 }
 0xc95   : > { %v2215_v10 = vmul.f32 %v3862_v2, %v2208_v3 }
 0xc97   : > { %v2222_v13 = vadd.f32 %v3863_v8, %v2215_v10 }
 0xc99   : > { %4247 = vmatmul.mubr.msk.f32.vlgmr.msra.gmra.mrb[22].mxu1 %vm738_vm10, %v2222_v13 }
 0xc9a   : > { %4465 = vmatpush3.bf16.msra.mxu1 %v4464_v11  ;;  %4257 = vmatprep.mubr.msk.f32.mxu1 %vm4682_vm0, %v4683_v7 }
 0xc9b   : > { %4466 = vmatprep.subr.bf16.mxu1 %v4681_v4 }
 0xc9e   : > { %4468 = vmatpush3.bf16.msra.mxu1 %v4467_v16 }
 0xc9f   : > { %4469 = vmatprep.subr.bf16.mxu1 %v4681_v4 }
 0xca1   : > { %4258 = vmatmul.mubr.msk.f32.vlgmr.msra.gmra.mrb[24].mxu1 %vm738_vm10, %v2222_v13 }
 0xca2   : > { %4471 = vmatpush3.bf16.msra.mxu1 %v4470_v19  ;;  %4268 = vmatprep.mubr.msk.f32.mxu1 %vm4682_vm0, %v4683_v7 }
 0xca3   : > { %4472 = vmatprep.subr.bf16.mxu1 %v4681_v4 }
 0xca6   : > { %4474 = vmatpush3.bf16.msra.mxu1 %v4473_v22 }
 0xca7   : > { %4271 = vmatprep.subr.mxu1 %v4683_v7 }
 0xca9   : > { %4269 = vmatmul.mubr.msk.f32.vlgmr.msra.gmra.mrb[26].mxu1 %vm738_vm10, %v2222_v13 }
 0xcaa   : > { %4273 = vmatprep.mubr.msk.f32.mxu1 %vm4682_vm0, %v4683_v7 }
 0xd6c   : > { %v2297_v23 = vpop.f32.mrb[22].mxu1 }
 0xd6d   : > { %2451 = vxpose.xlu0.b32.start.end [1/1] (short) (narrow) %v2297_v23, 32  ;;  %v4248_v24 = vpop.f32.mrb[23].mxu1 }
 0xd74   : > { %v2372_v25 = vpop.f32.mrb[24].mxu1 }
 0xd75   : > { %2483 = vxpose.xlu1.b32.start.end [1/1] (short) (narrow) %v2372_v25, 32  ;;  %v4259_v26 = vpop.f32.mrb[25].mxu1 }
 0xd7c   : > { %v5261_v27 = vpop.f32.mrb[26].mxu1 }
 0xd7d   : > { %v4270_v28 = vpop.f32.mrb[27].mxu1 }
 0xded   : > { %v2467_v29 = vpop.trf.xlu0 }
 0xdee   : > { %2547 = vxpose.xlu0.b32.start.end [1/1] (short) (narrow) %v2467_v29, 8 }
 0xdf1   : > { %v2468_v30 = vpop.trf.xlu0 }
 0xdf2   : > { %2652 = vxpose.xlu1.b32.start.end [1/1] (short) (narrow) %v2468_v30, 8 }
 0xdf5   : > { %v2469_v31 = vpop.trf.xlu0  ;;  %v2499_v32 = vpop.trf.xlu1 }
 0xdf6   : > { %2757 = vxpose.xlu0.b32.start.end [1/1] (short) (narrow) %v2469_v31, 8  ;;  %4272 = vmatpush3.msra.mxu1 %v2499_v32 }
 0xdf7   : > { %4276 = vmatprep.subr.mxu1 %v4683_v7 }
 0xdf9   : > { %v2470_v33 = vpop.trf.xlu0  ;;  %v2500_v34 = vpop.trf.xlu1 }
 0xdfa   : > { %2862 = vxpose.xlu0.b32.start.end [1/1] (short) (narrow) %v2470_v33, 8 }
 0xdfd   : > { %v2501_v35 = vpop.trf.xlu1 }
 0xdfe   : > { %4282 = vmatpush3.msra.mxu0 %v2501_v35 }
 0xdff   : > { %4291 = vmatprep.subr.mxu0 %v4683_v7 }
 0xe01   : > { %v2502_v36 = vpop.trf.xlu1 }
 0xe6e   : > { %v2563_v37 = vpop.trf.xlu0 }
 0xe6f   : > { %4274 = vmatmul.mubr.msk.f32.vlgmr.msra.gmra.mrb[28].mxu1 %vm1120_vm11, %v2563_v37  ;;  %v3892_v37 = vld [vmem:[%s5561_s6 + $0x28] sm:$0xff] }
 0xe70   : > { %4277 = vmatpush3.msra.mxu1 %v2500_v34  ;;  %4278 = vmatprep.mubr.msk.f32.mxu1 %vm4682_vm0, %v4683_v7 }
 0xe71   : > { %4286 = vmatprep.subr.mxu1 %v4683_v7 }
 0xe72   : > { %v2668_v38 = vpop.trf.xlu1 }
 0xe73   : > { %4279 = vmatmul.mubr.msk.f32.vlgmr.msra.gmra.mrb[30].mxu1 %vm1120_vm11, %v2668_v38  ;;  %v3893_v38 = vld [vmem:[%s5561_s6 + $0x30] sm:$0xff] }
 0xe74   : > { %4287 = vmatpush3.msra.mxu1 %v2502_v36  ;;  %4288 = vmatprep.mubr.msk.f32.mxu1 %vm4682_vm0, %v4683_v7  ;;  %v3891_v36 = vld [vmem:[%s5561_s6 + $0x20] sm:$0xff] }
 0xe75   : > { %4296 = vmatprep.subr.mxu1 %v4683_v7 }
 0xe76   : > { %v2773_v39 = vpop.trf.xlu0 }
 0xe77   : > { %4284 = vmatmul.mubr.msk.f32.vlgmr.msra.gmra.mrb[8].mxu0 %vm1120_vm11, %v2773_v39  ;;  %v4476_v39 = vpack.c.bf16 %v3892_v37, %v3891_v36  ;;  %v3923_v36 = vld [vmem:[%s5514_s14 + $0xf0] sm:$0xff]  ;;  %v3924_v37 = vld [vmem:[%s5514_s14 + $0xf8] sm:$0xff] }
 0xe78   : > { %4293 = vmatprep.mubr.msk.f32.mxu0 %vm4682_vm0, %v4683_v7 }
 0xe7a   : > { %v2878_v40 = vpop.trf.xlu0 }
 0xe7b   : > { %4289 = vmatmul.mubr.msk.f32.vlgmr.msra.gmra.mrb[32].mxu1 %vm1120_vm11, %v2878_v40  ;;  %v3894_v40 = vld [vmem:[%s5561_s6 + $0x38] sm:$0xff]  ;;  %s3771_s6 = scalar_lea.sflag [#allocation5], %s585_s20 }
 0xe7c   : > { %4298 = vmatprep.mubr.msk.f32.mxu1 %vm4682_vm0, %v4683_v7 }
 0xf42   : > { %v2648_v41 = vpop.f32.mrb[28].mxu1 }
 0xf43   : > { %v2967_v43 = vmul.f32 0.35355338, %v2648_v41  ;;  %v4275_v44 = vpop.f32.mrb[29].mxu1  ;;  %v4479_v41 = vpack.c.bf16 %v3894_v40, %v3893_v38  ;;  %v4509_v38 = vpack.c.bf16 %v3924_v37, %v3923_v36 }
 0xf45   : > { %v2971_v45 = vsel %vm5043_vm12, %v2967_v43, -1e+30 }
 0xf46   : > { %v2753_v46 = vpop.f32.mrb[30].mxu1  ;;  %v2975_v47 = vsel %vm1120_vm11, %v2971_v45, -inf }
 0xf47   : > { %v2968_v49 = vmul.f32 0.35355338, %v2753_v46  ;;  %2976 = vmax.xlane.f32.xlu0 %v2975_v47  ;;  %v4280_v50 = vpop.f32.mrb[31].mxu1 }
 0xf49   : > { %v2972_v51 = vsel %vm5043_vm12, %v2968_v49, -1e+30 }
 0xf4a   : > { %v2858_v9 = vpop.f32.mrb[8].mxu0  ;;  %v2978_v12 = vsel %vm1120_vm11, %v2972_v51, -inf }
 0xf4b   : > { %v2969_v53 = vmul.f32 0.35355338, %v2858_v9  ;;  %2979 = vmax.xlane.f32.xlu1 %v2978_v12  ;;  %v4285_v54 = vpop.f32.mrb[9].mxu0  ;;  %v3896_v12 = vld [vmem:[%s5562_s7 + $0x1] ss:$0 sm:$0xff]  ;;  %s4614_s7 = scalar_lea.vmem %s5460_s2, 128 }
 0xf4c   : > { %p4615_p1 = scmp.ne.s32.totalorder %s5460_s2, %s4614_s7  ;;  %p4622_p5 = scmp.lt.s32.totalorder %s4620_s25, %s4614_s7 }
 0xf4d   : > { %v2973_v55 = vsel %vm5043_vm12, %v2969_v53, -1e+30 }
 0xf4e   : > { %v2963_v57 = vpop.f32.mrb[32].mxu1  ;;  %v2981_v58 = vsel %vm1120_vm11, %v2973_v55, -inf  ;;  %p4616_p2 = pnand %p4615_p1, %p4828_p10  ;;  %p4623_p6 = por %p4622_p5, %p4621_p4 }
 0xf4f   : > { %v2970_v56 = vmul.f32 0.35355338, %v2963_v57  ;;  %2982 = vmax.xlane.f32.xlu1 %v2981_v58  ;;  %v4290_v59 = vpop.f32.mrb[33].mxu1 }
 0xf50   : > { %p4617_p3 = pneg %p4616_p2 }
 0xf51   : > { %v2974_v60 = vsel %vm5043_vm12, %v2970_v56, -1e+30 }
 0xf52   : > { %v2984_v61 = vsel %vm1120_vm11, %v2974_v60, -inf  ;;  %p4624_p7 = pnand %p4623_p6, %p4617_p3 }
 0xf53   : > { %2985 = vmax.xlane.f32.xlu1 %v2984_v61 }
 0xfd4   : > { %v2977_v62 = vpop.xlane.xlu0 %2976 }
 0xfd5   : > { %v2987_v63 = vsub.f32 %v2971_v45, %v2977_v62 }
 0xfd7   : > { %v2991_v48 = vmul.f32 1.442695, %v2987_v63  ;;  %v3902_v63 = vld [vmem:[%s5512_s12 + $0x20] sm:$0xff] }
 0xfd8   : > { %v2980_v0 = vpop.xlane.xlu1 %2979 }
 0xfd9   : > { %4582 = vpow2.f32 %v2991_v48  ;;  %v2988_v1 = vsub.f32 %v2972_v51, %v2980_v0  ;;  %v3904_v0 = vld [vmem:[%s5512_s12 + $0x30] sm:$0xff] }
 0xfdb   : > { %v2993_v2 = vmul.f32 1.442695, %v2988_v1  ;;  %v3905_v1 = vld [vmem:[%s5512_s12 + $0x38] sm:$0xff] }
 0xfdc   : > { %v2983_v3 = vpop.xlane.xlu1 %2982 }
 0xfdd   : > { %4584 = vpow2.f32 %v2993_v2  ;;  %v2989_v5 = vsub.f32 %v2973_v55, %v2983_v3  ;;  %v4485_v2 = vpack.c.bf16 %v3905_v1, %v3904_v0  ;;  %v3909_v3 = vld [vmem:[%s5514_s14 + $0x80] sm:$0xff] }
 0xfde   : > { %v3928_v0 = vld [vmem:[%s5517_s17] ss:$0 sm:$0xff] }
 0xfdf   : > { %v2995_v6 = vmul.f32 1.442695, %v2989_v5  ;;  %v3910_v5 = vld [vmem:[%s5514_s14 + $0x88] sm:$0xff] }
 0xfe0   : > { %v2986_v8 = vpop.xlane.xlu1 %2985 }
 0xfe1   : > { %4586 = vpow2.f32 %v2995_v6  ;;  %v2990_v10 = vsub.f32 %v2974_v60, %v2986_v8  ;;  %v3911_v6 = vld [vmem:[%s5514_s14 + $0x90] sm:$0xff]  ;;  %v4488_v8 = vpack.c.bf16 %v3910_v5, %v3909_v3  ;;  %v3929_v3 = vld [vmem:[%s5519_s19] ss:$0 sm:$0xff] }
 0xfe3   : > { %v4583_v11 = vpop.eup %4582  ;;  %v2997_v42 = vmul.f32 1.442695, %v2990_v10  ;;  %v3912_v10 = vld [vmem:[%s5514_s14 + $0x98] sm:$0xff] }
 0xfe4   : > { %v2999_v13 = vsel %vm1120_vm11, %v4583_v11, 0.0 }
 0xfe5   : > { %4588 = vpow2.f32 %v2997_v42  ;;  %3000 = vadd.xlane.f32.xlu0 %v2999_v13  ;;  %v3913_v42 = vld [vmem:[%s5514_s14 + $0xa0] sm:$0xff]  ;;  %v3914_v13 = vld [vmem:[%s5514_s14 + $0xa8] sm:$0xff] }
 0xfe7   : > { %v4585_v14 = vpop.eup %4584 }
 0xfe8   : > { %v3002_v15 = vsel %vm1120_vm11, %v4585_v14, 0.0 }
 0xfe9   : > { %3003 = vadd.xlane.f32.xlu1 %v3002_v15  ;;  %v3915_v15 = vld [vmem:[%s5514_s14 + $0xb0] sm:$0xff] }
 0xfeb   : > { %v4587_v16 = vpop.eup %4586 }
 0xfec   : > { %v3005_v17 = vsel %vm1120_vm11, %v4587_v16, 0.0 }
 0xfed   : > { %3006 = vadd.xlane.f32.xlu0 %v3005_v17 }
 0xfef   : > { %v4589_v18 = vpop.eup %4588 }
 0xff0   : > { %v3008_v19 = vsel %vm1120_vm11, %v4589_v18, 0.0 }
 0xff1   : > { %3009 = vadd.xlane.f32.xlu1 %v3008_v19  ;;  %v3918_v19 = vld [vmem:[%s5514_s14 + $0xc8] sm:$0xff] }
0x101a   : > { %2515 = vxpose.xlu0.b32.start.end [1/1] (short) (narrow) %v5261_v27, 32 }
0x1072   : > { %v3001_v20 = vpop.xlane.xlu0 %3000 }
0x1073   : > { %4590 = vrcp.f32 %v3001_v20 }
0x1076   : > { %v3004_v21 = vpop.xlane.xlu1 %3003 }
0x1077   : > { %4592 = vrcp.f32 %v3004_v21  ;;  %v3919_v21 = vld [vmem:[%s5514_s14 + $0xd0] sm:$0xff] }
0x107a   : > { %v3007_v26 = vpop.xlane.xlu0 %3006 }
0x107b   : > { %4594 = vrcp.f32 %v3007_v26 }
0x107d   : > { %v4591_v22 = vpop.eup %4590 }
0x107e   : > { %v3012_v23 = vmul.f32 %v4591_v22, %v4583_v11  ;;  %v3010_v28 = vpop.xlane.xlu1 %3009  ;;  %v4491_v11 = vpack.c.bf16 %v3912_v10, %v3911_v6  ;;  %v3920_v22 = vld [vmem:[%s5514_s14 + $0xd8] sm:$0xff] }
0x107f   : > { %4596 = vrcp.f32 %v3010_v28 }
0x1080   : > { %4292 = vmatpush3.xpose.msk.msra.mxu0 %vm1120_vm11, %v3012_v23  ;;  %v4503_v23 = vpack.c.bf16 %v3920_v22, %v3919_v21 }
0x1081   : > { %v4593_v24 = vpop.eup %4592  ;;  %4301 = vmatprep.subr.mxu0 %v4683_v7 }
0x1082   : > { %v3014_v25 = vmul.f32 %v4593_v24, %v4585_v14  ;;  %v4494_v14 = vpack.c.bf16 %v3914_v13, %v3913_v42  ;;  %v3921_v24 = vld [vmem:[%s5514_s14 + $0xe0] sm:$0xff] }
0x1084   : > { %4297 = vmatpush3.xpose.msk.msra.mxu1 %vm1120_vm11, %v3014_v25  ;;  %v3922_v25 = vld [vmem:[%s5514_s14 + $0xe8] sm:$0xff] }
0x1085   : > { %4306 = vmatprep.subr.mxu1 %v4683_v7  ;;  %v4595_v27 = vpop.eup %4594  ;;  %v4506_v26 = vpack.c.bf16 %v3922_v25, %v3921_v24 }
0x1086   : > { %v3016_v29 = vmul.f32 %v4595_v27, %v4587_v16  ;;  %v3916_v16 = vld [vmem:[%s5514_s14 + $0xb8] sm:$0xff] }
0x1087   : > { %v4497_v17 = vpack.c.bf16 %v3916_v16, %v3915_v15 }
0x1089   : > { %v4597_v31 = vpop.eup %4596 }
0x108a   : > { %v3018_v32 = vmul.f32 %v4597_v31, %v4589_v18  ;;  %v3917_v18 = vld [vmem:[%s5514_s14 + $0xc0] sm:$0xff] }
0x108b   : > { %v4500_v20 = vpack.c.bf16 %v3918_v19, %v3917_v18  ;;  %v3900_v31 = vld [vmem:[%s5510_s10 + $0x1] ss:$0 sm:$0xff] }
0x109a   : > { %v2531_v30 = vpop.trf.xlu0 }
0x109b   : > { %4294 = vmatmul.mubr.msk.f32.vlgmr.msra.gmra.mrb[10].mxu0 %vm1120_vm11, %v2531_v30 }
0x109c   : > { %4302 = vmatpush3.xpose.msk.msra.mxu0 %vm1120_vm11, %v3016_v29  ;;  %4303 = vmatprep.mubr.msk.f32.mxu0 %vm4682_vm0, %v4683_v7 }
0x109d   : > { %4475 = vmatprep.subr.bf16.mxu0 %v4681_v4 }
0x109e   : > { %v2532_v33 = vpop.trf.xlu0 }
0x109f   : > { %4299 = vmatmul.mubr.msk.f32.vlgmr.msra.gmra.mrb[34].mxu1 %vm1120_vm11, %v2532_v33  ;;  %v3901_v33 = vld [vmem:[%s5511_s11 + $0x1] ss:$0 sm:$0xff] }
0x10a0   : > { %4307 = vmatpush3.xpose.msk.msra.mxu1 %vm1120_vm11, %v3018_v32  ;;  %4308 = vmatprep.mubr.msk.f32.mxu1 %vm4682_vm0, %v4683_v7 }
0x10a1   : > { %4481 = vmatprep.subr.bf16.mxu1 %v4681_v4 }
0x10a2   : > { %v2533_v34 = vpop.trf.xlu0 }
0x10a3   : > { %4304 = vmatmul.mubr.msk.f32.vlgmr.msra.gmra.mrb[12].mxu0 %vm1120_vm11, %v2533_v34 }
0x10a4   : > { %4319 = vmatprep.mubr.msk.f32.mxu0 %vm4682_vm0, %v4683_v7  ;;  %4477 = vmatpush3.bf16.msra.mxu0 %v4476_v39  ;;  %v3907_v39 = vld [vmem:[%s5563_s28 + $0x1] ss:$0 sm:$0xff] }
0x10a5   : > { %4478 = vmatprep.subr.bf16.mxu0 %v4681_v4 }
0x10a6   : > { %v2534_v35 = vpop.trf.xlu0 }
0x10a7   : > { %4309 = vmatmul.mubr.msk.f32.vlgmr.msra.gmra.mrb[36].mxu1 %vm1120_vm11, %v2534_v35 }
0x10a8   : > { %4330 = vmatprep.mubr.msk.f32.mxu1 %vm4682_vm0, %v4683_v7  ;;  %4480 = vmatpush3.bf16.msra.mxu0 %v4479_v41 }
0x10a9   : > { %4487 = vmatprep.subr.bf16.mxu0 %v4681_v4 }
0x116e   : > { %v3091_v43 = vpop.f32.mrb[10].mxu0 }
0x116f   : > { %3323 = vxpose.xlu1.b32.start [1/4] (short) (narrow) %v3091_v43, 8  ;;  %v4295_v44 = vpop.f32.mrb[11].mxu0 }
0x1172   : > { %v3167_v45 = vpop.f32.mrb[34].mxu1 }
0x1173   : > { %v4300_v46 = vpop.f32.mrb[35].mxu1  ;;  %3324 = vxpose.xlu1.b32.cont [2/4] (short) (narrow) %v3167_v45, 8 }
0x1176   : > { %v3243_v47 = vpop.f32.mrb[12].mxu0 }
0x1177   : > { %3325 = vxpose.xlu1.b32.cont [3/4] (short) (narrow) %v3243_v47, 8  ;;  %v4305_v49 = vpop.f32.mrb[13].mxu0 }
0x117a   : > { %v3319_v50 = vpop.f32.mrb[36].mxu1 }
0x117b   : > { %v4310_v51 = vpop.f32.mrb[37].mxu1  ;;  %3326 = vxpose.xlu1.b32.end [4/4] (short) (narrow) %v3319_v50, 8 }
0x11ef   : > { %v3339_v9 = vpop.trf.xlu1 }
0x11f0   : > { %4320 = vmatmul.mubr.msk.f32.vlgmr.msra.gmra.mrb[14].mxu0 %vm738_vm10, %v3339_v9 }
0x11f1   : > { %4365 = vmatprep.mubr.msk.f32.mxu0 %vm4682_vm0, %v4683_v7  ;;  %4489 = vmatpush3.bf16.msra.mxu0 %v4488_v8 }
0x11f2   : > { %4490 = vmatprep.subr.bf16.mxu0 %v4681_v4 }
0x11f5   : > { %4492 = vmatpush3.bf16.msra.mxu0 %v4491_v11 }
0x11f6   : > { %4493 = vmatprep.subr.bf16.mxu0 %v4681_v4 }
0x11f9   : > { %4495 = vmatpush3.bf16.msra.mxu0 %v4494_v14 }
0x11fa   : > { %4496 = vmatprep.subr.bf16.mxu0 %v4681_v4 }
0x11fd   : > { %4498 = vmatpush3.bf16.msra.mxu0 %v4497_v17 }
0x11fe   : > { %4499 = vmatprep.subr.bf16.mxu0 %v4681_v4 }
0x1201   : > { %4501 = vmatpush3.bf16.msra.mxu0 %v4500_v20 }
0x1202   : > { %4502 = vmatprep.subr.bf16.mxu0 %v4681_v4 }
0x1205   : > { %4504 = vmatpush3.bf16.msra.mxu0 %v4503_v23 }
0x1206   : > { %4505 = vmatprep.subr.bf16.mxu0 %v4681_v4 }
0x1209   : > { %4507 = vmatpush3.bf16.msra.mxu0 %v4506_v26 }
0x120a   : > { %4508 = vmatprep.subr.bf16.mxu0 %v4681_v4 }
0x120d   : > { %4510 = vmatpush3.bf16.msra.mxu0 %v4509_v38 }
0x12c3   : > { %v3437_v53 = vpop.f32.mrb[14].mxu0 }
0x12c4   : > { %v3438_v54 = vadd.f32 %v3896_v12, %v3437_v53  ;;  %v4321_v55 = vpop.f32.mrb[15].mxu0 }
0x12c5   : > { %v3685_v55 = vld [vmem:[%s5518_s18] sm:$0xff] }
0x12c6   : > { %v5337_v57 = vadd.f32 %v3438_v54, %v5198_v52  ;;  %v3903_v52 = vld [vmem:[%s5512_s12 + $0x28] sm:$0xff] }
0x12c7   : > { %v4482_v48 = vpack.c.bf16 %v3903_v52, %v3902_v63 }
0x12c8   : > { %v3446_v58 = vsel %vm738_vm10, %v5337_v57, 0.0 }
0x12c9   : > { %3447 = vadd.xlane.f32.xlu0 %v3446_v58  ;;  %4483 = vmatpush3.bf16.msra.mxu1 %v4482_v48  ;;  %v3686_v58 = vld [vmem:[%s5518_s18 + $0x8] sm:$0xff] }
0x12ca   : > { %4484 = vmatprep.subr.bf16.mxu1 %v4681_v4 }
0x12cd   : > { %4486 = vmatpush3.bf16.msra.mxu1 %v4485_v2 }
0x12ce   : > { %4511 = vmatprep.subr.bf16.mxu1 %v4681_v4 }
0x1356   : > { %v3448_v56 = vpop.xlane.xlu0 %3447 }
0x1357   : > { %v3449_v59 = vmul.f32 0.03125, %v3448_v56  ;;  %v4512_v56 = vpack.c.bf16 %v3686_v58, %v3685_v55 }
0x1359   : > { %v3450_v60 = vsub.f32 %v5337_v57, %v3449_v59  ;;  %v3688_v59 = vld [vmem:[%s5518_s18 + $0x18] sm:$0xff] }
0x135b   : > { %v3451_v61 = vmul.f32 %v3450_v60, %v3450_v60 }
0x135d   : > { %v3452_v62 = vsel %vm738_vm10, %v3451_v61, 0.0 }
0x135e   : > { %3453 = vadd.xlane.f32.xlu1 %v3452_v62 }
0x13eb   : > { %v3454_v28 = vpop.xlane.xlu1 %3453 }
0x13ec   : > { %v3455_v27 = vmul.f32 0.03125, %v3454_v28 }
0x13ee   : > { %v3456_v29 = vadd.f32 1e-05, %v3455_v27 }
0x13f0   : > { %4598 = vrsqrt.f32 %v3456_v29 }
0x13fa   : > { %v4599_v30 = vpop.eup %4598 }
0x13fb   : > { %v3458_v32 = vmul.f32 %v4599_v30, %v3450_v60 }
0x13fd   : > { %v3465_v34 = vmul.f32 %v3900_v31, %v3458_v32 }
0x13ff   : > { %v3472_v35 = vadd.f32 %v3901_v33, %v3465_v34 }
0x1401   : > { %4331 = vmatmul.mubr.msk.f32.vlgmr.msra.gmra.mrb[38].mxu1 %vm738_vm10, %v3472_v35 }
0x1402   : > { %4376 = vmatprep.mubr.msk.f32.mxu1 %vm4682_vm0, %v4683_v7  ;;  %v3926_v7 = vld [vmem:[%s5515_s15 + $0x1] ss:$0 sm:$0xff]  ;;  %4513 = vmatpush3.bf16.msra.mxu1 %v4512_v56 }
0x1403   : > { %4514 = vmatprep.subr.bf16.mxu1 %v4681_v4  ;;  %v3927_v4 = vld [vmem:[%s5516_s16] ss:$0 sm:$0xff] }
0x14d4   : > { %v3555_v40 = vpop.f32.mrb[38].mxu1 }
0x14d5   : > { %v3556_v41 = vadd.f32 %v3907_v39, %v3555_v40  ;;  %v4332_v43 = vpop.f32.mrb[39].mxu1 }
0x14d7   : > { %v3559_v44 = vmax.f32 %v3556_v41, 0.0 }
0x14d9   : > { %4366 = vmatmul.mubr.f32.vlgmr.msra.gmra.mrb[16].mxu0 %v3559_v44 }
0x15ac   : > { %v3651_v45 = vpop.f32.mrb[16].mxu0 }
0x15ad   : > { %v3652_v46 = vadd.f32 %v3926_v7, %v3651_v45  ;;  %v4367_v47 = vpop.f32.mrb[17].mxu0 }
0x15af   : > { %v3655_v49 = vadd.f32 %v3652_v46, %v5337_v57  ;;  %v3687_v57 = vld [vmem:[%s5518_s18 + $0x10] sm:$0xff] }
0x15b0   : > { %v4515_v60 = vpack.c.bf16 %v3688_v59, %v3687_v57 }
0x15b1   : > { %v3658_v50 = vsel %vm738_vm10, %v3655_v49, 0.0 }
0x15b2   : > { %3659 = vadd.xlane.f32.xlu0 %v3658_v50  ;;  %4516 = vmatpush3.bf16.msra.mxu1 %v4515_v60 }
0x163f   : > { %v3660_v51 = vpop.xlane.xlu0 %3659 }
0x1640   : > { %v3661_v9 = vmul.f32 0.03125, %v3660_v51 }
0x1642   : > { %v3662_v12 = vsub.f32 %v3655_v49, %v3661_v9 }
0x1644   : > { %v3663_v53 = vmul.f32 %v3662_v12, %v3662_v12 }
0x1646   : > { %v3664_v54 = vsel %vm738_vm10, %v3663_v53, 0.0 }
0x1647   : > { %3665 = vadd.xlane.f32.xlu1 %v3664_v54 }
0x16d4   : > { %v3666_v61 = vpop.xlane.xlu1 %3665 }
0x16d5   : > { %v3667_v62 = vmul.f32 0.03125, %v3666_v61 }
0x16d7   : > { %v3668_v63 = vadd.f32 1e-05, %v3667_v62 }
0x16d9   : > { %4600 = vrsqrt.f32 %v3668_v63 }
0x16e3   : > { %v4601_v52 = vpop.eup %4600 }
0x16e4   : > { %v3670_v48 = vmul.f32 %v4601_v52, %v3662_v12 }
0x16e6   : > { %v3677_v1 = vmul.f32 %v3927_v4, %v3670_v48 }
0x16e8   : > { %v3684_v2 = vadd.f32 %v3928_v0, %v3677_v1 }
0x16ea   : > { %4377 = vmatmul.mubr.msk.f32.vlgmr.msra.gmra.mrb[40].mxu1 %vm738_vm10, %v3684_v2 }
0x17bd   : > { %v3765_v5 = vpop.f32.mrb[40].mxu1 }
0x17be   : > { %v3766_v6 = vadd.f32 %v3929_v3, %v3765_v5  ;;  %v4378_v8 = vpop.f32.mrb[41].mxu1 }
0x17c0   : > { %3769 = vst [vmem:[%s587_s23] sm:$0xff] %v3766_v6 }
0x17c1   : > { %4627 = shalt.err (!%p4624_p7)
}
0x17c2   : > { %s4628_s22 = scalar_lea.hbm %s5458_s5, 128  ;;  %s4632_s26 = scalar_lea.hbm %s5565_s30, 256 }
0x17c3   : > { %p4629_p8 = scmp.ne.s32.totalorder %s5458_s5, %s4628_s22  ;;  %p4633_p13 = scmp.lt.u32.totalorder %s5458_s5, %s5565_s30 }
0x17c4   : > { %p4634_p0 = scmp.lt.u32.totalorder %s4632_s26, %s4628_s22  ;;  %p4636_p2 = scmp.lt.u32.totalorder %s4628_s22, %s5458_s5 }
0x17c5   : > { %p4630_p9 = pnand %p4629_p8, %p4828_p10 }
0x17c6   : > { %p4635_p1 = por %p4634_p0, %p4633_p13 }
0x17c7   : > { %p4631_p12 = pneg %p4630_p9 }
0x17c8   : > { %p4637_p3 = por %p4636_p2, %p4635_p1 }
0x17ca   : > { %p4638_p4 = pnand %p4637_p3, %p4631_p12 }
0x17cc   : > { %4641 = shalt.err (!%p4638_p4)
}
0x17cd   : > { %4517 = dma.vmem_to_hbm [thread:$0]  (%p4828_p10), %s5460_s2, 128, %s5458_s5, %s3771_s6  }
0x17ce PF: > { %s5566_s7 = sld [smem:[#allocation10_spill]]  ;;  %s5567_s4 = sld [smem:[#allocation8_spill]] }
0x17d4   : > { %p4523_p5 = scmp.ge.s32.totalorder %s5566_s7, 2  ;;  %s3796_s25 = sand.u32 1, %s5567_s4  }
0x17d5   : > { %s3797_s20 = scalar_lea.sflag [#allocation5], %s3796_s25 }
0x17d6   : > { %p4520_p6 = pnand %p4523_p5, %p4832_p11 }
0x17d8   : > { %4661 = dma.done.wait (!%p4520_p6), %s3797_s20, 128  }
0x17d9   : > { %4663 = vsyncadd (!%p4520_p6), %s3797_s20, 4294967168  ;;  %s5569_s27 = sld [smem:[#allocation11_spill]]  ;;  %s5570_s22 = sld [smem:[#allocation9_spill]] }
0x17da   : > { %s5571_s26 = sld [smem:[#allocation12_spill]]  ;;  %s5572_s25 = smov %s4670_s3 }
0x17df   : > { %p36_p7 = scmp.ge.s32.totalorder %s5569_s27, 4   ;;  %s5573_s3 = smov %s5570_s22 }
0x17e1   :  { %38 = sbr.rel (!%p36_p7) target bundleno = 27 (0x1b), region = 141 }
0x17e8   :  { %3802 = vsyncpa [#allocation5], 1 }
0x17e9   :  { %3804 = vsyncpa [#allocation5 + $0x1], 1 }

</bundles_post_ra>
